<compile_context>
chip_gen: v7x
topology: tpu7x:2x2x1
jax: 0.10.0
libtpu: 0.0.40
codegen_flags: <defaults>
</compile_context>

<pallas_src>
import jax
import jax.numpy as jnp
from jax.experimental import pallas as pl
from jax.experimental.pallas import tpu as pltpu

_SUBLANES_BF16 = 16  # bf16 sublane packing; pad batch to this so all (B, .) ops are dense


def _vmem_limit_bytes():
    """Scoped-VMEM limit: raised above v5e's 16 MiB default, capped below v7x's 64 MiB."""
    try:
        cap = pltpu.get_tpu_info().vmem_capacity_bytes  # 128 MiB v5e/v6e, 64 MiB/TC v7x
    except Exception:
        cap = 64 * 1024 * 1024
    return int(min(cap // 2, 48 * 1024 * 1024))


def _pick_time_block(T, batch, in_size, hidden, budget_bytes):
    """Largest divisor of T whose per-grid-step working set fits the VMEM budget."""
    G = 4 * hidden
    # Constant-index weights (double-buffered by default; pl.Buffered(1) would halve this
    # on v7x) + fp32 h/c scratch.
    fixed = 2 * (in_size * G + hidden * G) * 2 + 2 * batch * hidden * 4
    for tb in sorted((d for d in range(1, T + 1) if T % d == 0), reverse=True):
        per = (2 * tb * batch * in_size * 2    # bf16 x block, double-buffered
               + 2 * tb * batch * hidden * 2   # bf16 h_seq block, double-buffered
               + tb * batch * G * 4)           # fp32 x_proj scratch
        if fixed + per <= budget_bytes:
            return tb
    return 1


# ----------------------- shared recurrent step math ---------------------------
def _lstm_steps(xp_scr, whh_ref, h_scr, c_scr, hseq_ref=None):
    """Run all timesteps of this block; gates = x_proj[t] + h_prev @ W_hh^T (bf16 MXU,
    fp32 accumulate, fp32 gate/cell math)."""
    batch, H = h_scr.shape
    tb = xp_scr.shape[0] // batch
    mxu_dtype = whh_ref.dtype

    def step(tt, carry):
        row = pl.multiple_of(tt * batch, batch)       # aligned (batch is 16-multiple)
        h_prev = h_scr[...]
        c_prev = c_scr[...]
        gates = xp_scr[pl.ds(row, batch), :] + jnp.dot(
            h_prev.astype(mxu_dtype), whh_ref[...],
            preferred_element_type=jnp.float32)
        # PyTorch gate order: i, f, g, o (H = 128 keeps slices lane-aligned)
        i_g = jax.nn.sigmoid(gates[:, 0 * H:1 * H])
        f_g = jax.nn.sigmoid(gates[:, 1 * H:2 * H])
        g_g = jnp.tanh(gates[:, 2 * H:3 * H])
        o_g = jax.nn.sigmoid(gates[:, 3 * H:4 * H])
        c_new = f_g * c_prev + i_g * g_g
        h_new = o_g * jnp.tanh(c_new)
        c_scr[...] = c_new
        h_scr[...] = h_new
        if hseq_ref is not None:
            hseq_ref[pl.ds(row, batch), :] = h_new.astype(hseq_ref.dtype)
        return carry

    # Cap the unroll: full unroll of deep time blocks risks vreg spills (64 vregs).
    jax.lax.fori_loop(0, tb, step, 0, unroll=min(tb, 8))


# --------------- recurrence kernel, intermediate layers (emit h_seq) -----------
def _lstm_seq_kernel(x_ref, wih_ref, whh_ref, b_ref, hseq_ref, xp_scr, h_scr, c_scr):
    @pl.when(pl.program_id(0) == 0)
    def _():
        h_scr[...] = jnp.zeros_like(h_scr)
        c_scr[...] = jnp.zeros_like(c_scr)

    # Fused, hoisted input projection for this time block: ONE MXU GEMM, M = Tb*B.
    xp_scr[...] = (
        jnp.dot(x_ref[...], wih_ref[...], preferred_element_type=jnp.float32)
        + b_ref[...]
    )
    _lstm_steps(xp_scr, whh_ref, h_scr, c_scr, hseq_ref=hseq_ref)


def lstm_layer_seq(x2d, wih_t, whh_t, b_row, batch, time_block):
    """x2d: (T*B, in) bf16 time-major-flattened. Returns h_seq2d: (T*B, H) bf16."""
    TB, I = x2d.shape
    T = TB // batch
    H, G = whh_t.shape
    rows = time_block * batch
    return pl.pallas_call(
        _lstm_seq_kernel,
        out_shape=jax.ShapeDtypeStruct((TB, H), jnp.bfloat16),
        grid_spec=pltpu.PrefetchScalarGridSpec(
            num_scalar_prefetch=0,
            grid=(T // time_block,),
            in_specs=[
                pl.BlockSpec((rows, I), lambda i: (i, 0)),
                # Constant-index weights (v7x: pipeline_mode=pl.Buffered(1) / 4H-tiling
                # for large H to avoid double-buffered weight footprint).
                pl.BlockSpec((I, G), lambda i: (0, 0)),
                pl.BlockSpec((H, G), lambda i: (0, 0)),
                pl.BlockSpec((1, G), lambda i: (0, 0)),
            ],
            out_specs=pl.BlockSpec((rows, H), lambda i: (i, 0)),
            scratch_shapes=[
                pltpu.VMEM((rows, G), jnp.float32),   # x_proj for this time block
                pltpu.VMEM((batch, H), jnp.float32),  # h carried across grid steps
                pltpu.VMEM((batch, H), jnp.float32),  # c carried across grid steps
            ],
        ),
        compiler_params=pltpu.CompilerParams(
            dimension_semantics=("arbitrary",),  # recurrent -> sequential
            vmem_limit_bytes=_vmem_limit_bytes(),
        ),
    )(x2d, wih_t, whh_t, b_row)


# -------- recurrence kernel, last layer (no h_seq writeback, fused Linear) -----
def _lstm_last_fc_kernel(x_ref, wih_ref, whh_ref, b_ref, fcw_ref, fcb_ref,
                         out_ref, xp_scr, h_scr, c_scr):
    blk = pl.program_id(0)

    @pl.when(blk == 0)
    def _():
        h_scr[...] = jnp.zeros_like(h_scr)
        c_scr[...] = jnp.zeros_like(c_scr)

    xp_scr[...] = (
        jnp.dot(x_ref[...], wih_ref[...], preferred_element_type=jnp.float32)
        + b_ref[...]
    )
    _lstm_steps(xp_scr, whh_ref, h_scr, c_scr, hseq_ref=None)

    @pl.when(blk == pl.num_programs(0) - 1)
    def _():
        # fc(out[:, -1, :]) fused: no (T,B,H) writeback, no extra kernel launch.
        out_ref[...] = (
            jnp.dot(h_scr[...].astype(fcw_ref.dtype), fcw_ref[...],
                    preferred_element_type=jnp.float32)
            + fcb_ref[...]
        ).astype(out_ref.dtype)


def lstm_layer_last_fc(x2d, wih_t, whh_t, b_row, fc_w_t, fc_b_row, batch, time_block):
    """x2d: (T*B, in) bf16. Returns fc(h_T): (B, O) fp32."""
    TB, I = x2d.shape
    T = TB // batch
    H, G = whh_t.shape
    O = fc_w_t.shape[1]
    rows = time_block * batch
    return pl.pallas_call(
        _lstm_last_fc_kernel,
        out_shape=jax.ShapeDtypeStruct((batch, O), jnp.float32),
        grid_spec=pltpu.PrefetchScalarGridSpec(
            num_scalar_prefetch=0,
            grid=(T // time_block,),
            in_specs=[
                pl.BlockSpec((rows, I), lambda i: (i, 0)),
                pl.BlockSpec((I, G), lambda i: (0, 0)),
                pl.BlockSpec((H, G), lambda i: (0, 0)),
                pl.BlockSpec((1, G), lambda i: (0, 0)),
                pl.BlockSpec((H, O), lambda i: (0, 0)),
                pl.BlockSpec((1, O), lambda i: (0, 0)),
            ],
            out_specs=pl.BlockSpec((batch, O), lambda i: (0, 0)),  # resident output
            scratch_shapes=[
                pltpu.VMEM((rows, G), jnp.float32),
                pltpu.VMEM((batch, H), jnp.float32),
                pltpu.VMEM((batch, H), jnp.float32),
            ],
        ),
        compiler_params=pltpu.CompilerParams(
            dimension_semantics=("arbitrary",),
            vmem_limit_bytes=_vmem_limit_bytes(),
        ),
    )(x2d, wih_t, whh_t, b_row, fc_w_t, fc_b_row)


# ------------------------------ Model wrapper ---------------------------------
def simple_lstm_forward(x, params, time_block=None):
    """x: (B, T, I) (PyTorch batch_first). Returns (B, output_size) fp32."""
    B, T, I = x.shape
    lstm = params["lstm"]
    num_layers = len(lstm)
    H = lstm[0][1].shape[1]

    # Pad batch to the bf16 sublane count so every per-timestep op is sublane-dense
    # and bf16 h_seq stores stay tile-aligned.
    B_pad = max(_SUBLANES_BF16, ((B + _SUBLANES_BF16 - 1) // _SUBLANES_BF16) * _SUBLANES_BF16)
    xp = x if B_pad == B else jnp.pad(x, ((0, B_pad - B), (0, 0), (0, 0)))

    if time_block is None:
        time_block = _pick_time_block(T, B_pad, max(I, H), H,
                                      budget_bytes=int(0.7 * _vmem_limit_bytes()))
    assert T % time_block == 0, "time_block must divide T"

    # Time-major, flattened to 2-D (lane-dense) and cast once to bf16 for the MXU.
    h2d = jnp.transpose(xp, (1, 0, 2)).reshape(T * B_pad, I).astype(jnp.bfloat16)

    for layer, (w_ih, w_hh, b_ih, b_hh) in enumerate(lstm):
        wih_t = jnp.transpose(w_ih).astype(jnp.bfloat16)      # (in, 4H)
        whh_t = jnp.transpose(w_hh).astype(jnp.bfloat16)      # (H, 4H)
        b_row = (b_ih + b_hh).reshape(1, -1).astype(jnp.float32)
        if layer == num_layers - 1:
            fc_w_t = jnp.transpose(params["fc_w"]).astype(jnp.bfloat16)   # (H, O)
            fc_b_row = params["fc_b"].reshape(1, -1).astype(jnp.float32)
            out = lstm_layer_last_fc(h2d, wih_t, whh_t, b_row, fc_w_t, fc_b_row,
                                     B_pad, time_block)
            return out[:B]
        h2d = lstm_layer_seq(h2d, wih_t, whh_t, b_row, B_pad, time_block)
    raise AssertionError("num_layers must be >= 1")


def init_params(key, input_size, hidden_size, num_layers, output_size):
    """Deterministic synthetic init, matching PyTorch parameter shapes."""
    params = {"lstm": []}
    k = 1.0 / jnp.sqrt(hidden_size)
    for layer in range(num_layers):
        in_sz = input_size if layer == 0 else hidden_size
        key, k1, k2, k3, k4 = jax.random.split(key, 5)
        w_ih = jax.random.uniform(k1, (4 * hidden_size, in_sz), jnp.float32, -k, k)
        w_hh = jax.random.uniform(k2, (4 * hidden_size, hidden_size), jnp.float32, -k, k)
        b_ih = jax.random.uniform(k3, (4 * hidden_size,), jnp.float32, -k, k)
        b_hh = jax.random.uniform(k4, (4 * hidden_size,), jnp.float32, -k, k)
        params["lstm"].append((w_ih, w_hh, b_ih, b_hh))
    key, k5, k6 = jax.random.split(key, 3)
    params["fc_w"] = jax.random.uniform(k5, (output_size, hidden_size), jnp.float32, -k, k)
    params["fc_b"] = jax.random.uniform(k6, (output_size,), jnp.float32, -k, k)
    return params


# --------------------------- pure-JAX reference -------------------------------
def reference_forward(x, params, mxu_dtype=jnp.float32):
    """mxu_dtype=bf16 mirrors the kernel numerics (bf16 matmul operands, fp32 accum);
    mxu_dtype=f32 is the exact fp32 module semantics."""
    B, T, _ = x.shape
    h_in = x
    for (w_ih, w_hh, b_ih, b_hh) in params["lstm"]:
        H = w_hh.shape[1]
        h = jnp.zeros((B, H), jnp.float32)
        c = jnp.zeros((B, H), jnp.float32)
        wih_t = w_ih.T.astype(mxu_dtype)
        whh_t = w_hh.T.astype(mxu_dtype)
        bias = (b_ih + b_hh).astype(jnp.float32)
        outs = []
        for t in range(T):
            x_t = h_in[:, t, :].astype(mxu_dtype)
            gates = (jnp.dot(x_t, wih_t, preferred_element_type=jnp.float32)
                     + jnp.dot(h.astype(mxu_dtype), whh_t,
                               preferred_element_type=jnp.float32)
                     + bias)
            i_g = jax.nn.sigmoid(gates[:, 0 * H:1 * H])
            f_g = jax.nn.sigmoid(gates[:, 1 * H:2 * H])
            g_g = jnp.tanh(gates[:, 2 * H:3 * H])
            o_g = jax.nn.sigmoid(gates[:, 3 * H:4 * H])
            c = f_g * c + i_g * g_g
            h = o_g * jnp.tanh(c)
            outs.append(h)
        h_in = jnp.stack(outs, axis=1).astype(mxu_dtype)  # mirrors bf16 h_seq between layers
    h_last = h_in[:, -1, :].astype(mxu_dtype)
    return (jnp.dot(h_last, params["fc_w"].T.astype(mxu_dtype),
                    preferred_element_type=jnp.float32) + params["fc_b"])


if __name__ == "__main__":
    # Small shapes consistent with SimpleLSTM(input_size, hidden, layers, out, dropout).
    # H = 128 keeps gate slices / h stores lane-dense.
    B, T = 2, 8
    input_size, hidden_size, num_layers, output_size = 16, 128, 2, 4

    key = jax.random.PRNGKey(0)
    key, kx, kp = jax.random.split(key, 3)
    x = jax.random.normal(kx, (B, T, input_size), jnp.float32)
    params = init_params(kp, input_size, hidden_size, num_layers, output_size)

    # time_block=4 -> 2 grid steps per recurrent kernel (exercises carried h/c scratch).
    out = simple_lstm_forward(x, params, time_block=4)
    out = jax.block_until_ready(out)
    assert out.shape == (B, output_size)

    # Default (VMEM-budget-aware) time_block path: single grid step at this size.
    out_default = jax.block_until_ready(simple_lstm_forward(x, params))

    ref_bf16 = reference_forward(x, params, mxu_dtype=jnp.bfloat16)  # kernel-numerics mirror
    ref_f32 = reference_forward(x, params, mxu_dtype=jnp.float32)    # true module semantics
    assert jnp.allclose(out, ref_bf16, atol=5e-3, rtol=5e-3), "mismatch vs bf16 reference"
    assert jnp.allclose(out, ref_f32, atol=3e-2, rtol=3e-2), "mismatch vs fp32 reference"
    assert jnp.allclose(out_default, ref_bf16, atol=5e-3, rtol=5e-3), "default-block mismatch"

    print("KERNEL_OK")
</pallas_src>

<mosaic_0001>
module attributes {stable_mosaic.version = 11 : i64} {
  func.func @_lstm_seq_kernel(%arg0: i32, %arg1: memref<64x16xbf16, #tpu.memory_space<vmem>>, %arg2: memref<16x512xbf16, #tpu.memory_space<vmem>>, %arg3: memref<128x512xbf16, #tpu.memory_space<vmem>>, %arg4: memref<1x512xf32, #tpu.memory_space<vmem>>, %arg5: memref<64x128xbf16, #tpu.memory_space<vmem>>, %arg6: memref<64x512xf32, #tpu.memory_space<vmem>>, %arg7: memref<16x128xf32, #tpu.memory_space<vmem>>, %arg8: memref<16x128xf32, #tpu.memory_space<vmem>>) attributes {dimension_semantics = [#tpu.dimension_semantics<arbitrary>], iteration_bounds = array<i64: 2>, scalar_prefetch = 0 : i64, scratch_operands = 3 : i64, tpu.core_type = #tpu.core_type<tc>, window_params = [{transform_indices = @transform_0, window_bounds = array<i64: 64, 16>}, {pipeline_mode = #tpu.pipeline_mode<synchronous>, transform_indices = @transform_1, window_bounds = array<i64: 16, 512>}, {pipeline_mode = #tpu.pipeline_mode<synchronous>, transform_indices = @transform_2, window_bounds = array<i64: 128, 512>}, {pipeline_mode = #tpu.pipeline_mode<synchronous>, transform_indices = @transform_3, window_bounds = array<i64: 1, 512>}, {transform_indices = @transform_4, window_bounds = array<i64: 64, 128>}]} {
    %c0_i32 = arith.constant 0 : i32
    %0 = arith.cmpi eq, %arg0, %c0_i32 : i32
    %1 = arith.extui %0 : i1 to i32
    %c0_i32_0 = arith.constant 0 : i32
    %2 = arith.cmpi ne, %1, %c0_i32_0 : i32
    scf.if %2 {
      %cst_76 = arith.constant 0.000000e+00 : f32
      %170 = vector.broadcast %cst_76 : f32 to vector<16x128xf32>
      %c0_77 = arith.constant 0 : index
      %c0_78 = arith.constant 0 : index
      %171 = vector.load %arg7[%c0_77, %c0_78] : memref<16x128xf32, #tpu.memory_space<vmem>>, vector<16x128xf32>
      tpu.vector_store %arg7[%c0_77, %c0_78], %170 {strides = array<i32>} : memref<16x128xf32, #tpu.memory_space<vmem>>, vector<16x128xf32>,
      %cst_79 = arith.constant 0.000000e+00 : f32
      %172 = vector.broadcast %cst_79 : f32 to vector<16x128xf32>
      %c0_80 = arith.constant 0 : index
      %c0_81 = arith.constant 0 : index
      %173 = vector.load %arg8[%c0_80, %c0_81] : memref<16x128xf32, #tpu.memory_space<vmem>>, vector<16x128xf32>
      tpu.vector_store %arg8[%c0_80, %c0_81], %172 {strides = array<i32>} : memref<16x128xf32, #tpu.memory_space<vmem>>, vector<16x128xf32>,
    } else {
    }
    %c0 = arith.constant 0 : index
    %c0_1 = arith.constant 0 : index
    %3 = vector.load %arg1[%c0, %c0_1] : memref<64x16xbf16, #tpu.memory_space<vmem>>, vector<64x16xbf16>
    %c0_2 = arith.constant 0 : index
    %c0_3 = arith.constant 0 : index
    %4 = vector.load %arg2[%c0_2, %c0_3] : memref<16x512xbf16, #tpu.memory_space<vmem>>, vector<16x512xbf16>
    %cst = arith.constant dense<0.000000e+00> : vector<64x512xf32>
    %5 = tpu.matmul %3, %4, %cst {dimension_numbers = #tpu.dot_dimension_numbers<[1], [0], [0], [1], [0, 0, 1, 1], [], []>} : vector<64x16xbf16>, vector<16x512xbf16>, vector<64x512xf32> -> vector<64x512xf32>
    %c0_4 = arith.constant 0 : index
    %c0_5 = arith.constant 0 : index
    %6 = vector.load %arg4[%c0_4, %c0_5] : memref<1x512xf32, #tpu.memory_space<vmem>>, vector<1x512xf32>
    %7 = vector.broadcast %6 : vector<1x512xf32> to vector<64x512xf32>
    %8 = arith.addf %5, %7 : vector<64x512xf32>
    %c0_6 = arith.constant 0 : index
    %c0_7 = arith.constant 0 : index
    %9 = vector.load %arg6[%c0_6, %c0_7] : memref<64x512xf32, #tpu.memory_space<vmem>>, vector<64x512xf32>
    tpu.vector_store %arg6[%c0_6, %c0_7], %8 {strides = array<i32>} : memref<64x512xf32, #tpu.memory_space<vmem>>, vector<64x512xf32>,
    %c0_i32_8 = arith.constant 0 : i32
    %c16_i32 = arith.constant 16 : i32
    %10 = arith.muli %c0_i32_8, %c16_i32 : i32
    %11 = tpu.assume_multiple %10, 16 : i32
    %c0_9 = arith.constant 0 : index
    %c0_10 = arith.constant 0 : index
    %12 = vector.load %arg7[%c0_9, %c0_10] : memref<16x128xf32, #tpu.memory_space<vmem>>, vector<16x128xf32>
    %c0_11 = arith.constant 0 : index
    %c0_12 = arith.constant 0 : index
    %13 = vector.load %arg8[%c0_11, %c0_12] : memref<16x128xf32, #tpu.memory_space<vmem>>, vector<16x128xf32>
    %14 = arith.index_cast %11 : i32 to index
    %c0_13 = arith.constant 0 : index
    %15 = vector.load %arg6[%14, %c0_13] : memref<64x512xf32, #tpu.memory_space<vmem>>, vector<16x512xf32>
    %16 = arith.truncf %12 : vector<16x128xf32> to vector<16x128xbf16>
    %c0_14 = arith.constant 0 : index
    %c0_15 = arith.constant 0 : index
    %17 = vector.load %arg3[%c0_14, %c0_15] : memref<128x512xbf16, #tpu.memory_space<vmem>>, vector<128x512xbf16>
    %cst_16 = arith.constant dense<0.000000e+00> : vector<16x512xf32>
    %18 = tpu.matmul %16, %17, %cst_16 {dimension_numbers = #tpu.dot_dimension_numbers<[1], [0], [0], [1], [0, 0, 1, 1], [], []>} : vector<16x128xbf16>, vector<128x512xbf16>, vector<16x512xf32> -> vector<16x512xf32>
    %19 = arith.addf %15, %18 : vector<16x512xf32>
    %20 = vector.extract_strided_slice %19 {offsets = [0, 0], sizes = [16, 128], strides = [1, 1]} : vector<16x512xf32> to vector<16x128xf32>
    %21 = arith.negf %20 : vector<16x128xf32>
    %22 = math.exp %21 : vector<16x128xf32>
    %cst_17 = arith.constant 1.000000e+00 : f32
    %23 = vector.broadcast %cst_17 : f32 to vector<16x128xf32>
    %24 = arith.addf %23, %22 : vector<16x128xf32>
    %25 = arith.divf %23, %24 : vector<16x128xf32>
    %26 = vector.extract_strided_slice %19 {offsets = [0, 128], sizes = [16, 128], strides = [1, 1]} : vector<16x512xf32> to vector<16x128xf32>
    %27 = arith.negf %26 : vector<16x128xf32>
    %28 = math.exp %27 : vector<16x128xf32>
    %cst_18 = arith.constant 1.000000e+00 : f32
    %29 = vector.broadcast %cst_18 : f32 to vector<16x128xf32>
    %30 = arith.addf %29, %28 : vector<16x128xf32>
    %31 = arith.divf %29, %30 : vector<16x128xf32>
    %32 = vector.extract_strided_slice %19 {offsets = [0, 256], sizes = [16, 128], strides = [1, 1]} : vector<16x512xf32> to vector<16x128xf32>
    %33 = math.tanh %32 : vector<16x128xf32>
    %34 = vector.extract_strided_slice %19 {offsets = [0, 384], sizes = [16, 128], strides = [1, 1]} : vector<16x512xf32> to vector<16x128xf32>
    %35 = arith.negf %34 : vector<16x128xf32>
    %36 = math.exp %35 : vector<16x128xf32>
    %cst_19 = arith.constant 1.000000e+00 : f32
    %37 = vector.broadcast %cst_19 : f32 to vector<16x128xf32>
    %38 = arith.addf %37, %36 : vector<16x128xf32>
    %39 = arith.divf %37, %38 : vector<16x128xf32>
    %40 = arith.mulf %31, %13 : vector<16x128xf32>
    %41 = arith.mulf %25, %33 : vector<16x128xf32>
    %42 = arith.addf %40, %41 : vector<16x128xf32>
    %43 = math.tanh %42 : vector<16x128xf32>
    %44 = arith.mulf %39, %43 : vector<16x128xf32>
    %c0_20 = arith.constant 0 : index
    %c0_21 = arith.constant 0 : index
    %45 = vector.load %arg8[%c0_20, %c0_21] : memref<16x128xf32, #tpu.memory_space<vmem>>, vector<16x128xf32>
    tpu.vector_store %arg8[%c0_20, %c0_21], %42 {strides = array<i32>} : memref<16x128xf32, #tpu.memory_space<vmem>>, vector<16x128xf32>,
    %c0_22 = arith.constant 0 : index
    %c0_23 = arith.constant 0 : index
    %46 = vector.load %arg7[%c0_22, %c0_23] : memref<16x128xf32, #tpu.memory_space<vmem>>, vector<16x128xf32>
    tpu.vector_store %arg7[%c0_22, %c0_23], %44 {strides = array<i32>} : memref<16x128xf32, #tpu.memory_space<vmem>>, vector<16x128xf32>,
    %47 = arith.truncf %44 : vector<16x128xf32> to vector<16x128xbf16>
    %48 = arith.index_cast %11 : i32 to index
    %c0_24 = arith.constant 0 : index
    %49 = vector.load %arg5[%48, %c0_24] : memref<64x128xbf16, #tpu.memory_space<vmem>>, vector<16x128xbf16>
    tpu.vector_store %arg5[%48, %c0_24], %47 {strides = array<i32>} : memref<64x128xbf16, #tpu.memory_space<vmem>>, vector<16x128xbf16>,
    %c1_i32 = arith.constant 1 : i32
    %c16_i32_25 = arith.constant 16 : i32
    %50 = arith.muli %c1_i32, %c16_i32_25 : i32
    %51 = tpu.assume_multiple %50, 16 : i32
    %c0_26 = arith.constant 0 : index
    %c0_27 = arith.constant 0 : index
    %52 = vector.load %arg7[%c0_26, %c0_27] : memref<16x128xf32, #tpu.memory_space<vmem>>, vector<16x128xf32>
    %c0_28 = arith.constant 0 : index
    %c0_29 = arith.constant 0 : index
    %53 = vector.load %arg8[%c0_28, %c0_29] : memref<16x128xf32, #tpu.memory_space<vmem>>, vector<16x128xf32>
    %54 = arith.index_cast %51 : i32 to index
    %c0_30 = arith.constant 0 : index
    %55 = vector.load %arg6[%54, %c0_30] : memref<64x512xf32, #tpu.memory_space<vmem>>, vector<16x512xf32>
    %56 = arith.truncf %52 : vector<16x128xf32> to vector<16x128xbf16>
    %c0_31 = arith.constant 0 : index
    %c0_32 = arith.constant 0 : index
    %57 = vector.load %arg3[%c0_31, %c0_32] : memref<128x512xbf16, #tpu.memory_space<vmem>>, vector<128x512xbf16>
    %cst_33 = arith.constant dense<0.000000e+00> : vector<16x512xf32>
    %58 = tpu.matmul %56, %57, %cst_33 {dimension_numbers = #tpu.dot_dimension_numbers<[1], [0], [0], [1], [0, 0, 1, 1], [], []>} : vector<16x128xbf16>, vector<128x512xbf16>, vector<16x512xf32> -> vector<16x512xf32>
    %59 = arith.addf %55, %58 : vector<16x512xf32>
    %60 = vector.extract_strided_slice %59 {offsets = [0, 0], sizes = [16, 128], strides = [1, 1]} : vector<16x512xf32> to vector<16x128xf32>
    %61 = arith.negf %60 : vector<16x128xf32>
    %62 = math.exp %61 : vector<16x128xf32>
    %cst_34 = arith.constant 1.000000e+00 : f32
    %63 = vector.broadcast %cst_34 : f32 to vector<16x128xf32>
    %64 = arith.addf %63, %62 : vector<16x128xf32>
    %65 = arith.divf %63, %64 : vector<16x128xf32>
    %66 = vector.extract_strided_slice %59 {offsets = [0, 128], sizes = [16, 128], strides = [1, 1]} : vector<16x512xf32> to vector<16x128xf32>
    %67 = arith.negf %66 : vector<16x128xf32>
    %68 = math.exp %67 : vector<16x128xf32>
    %cst_35 = arith.constant 1.000000e+00 : f32
    %69 = vector.broadcast %cst_35 : f32 to vector<16x128xf32>
    %70 = arith.addf %69, %68 : vector<16x128xf32>
    %71 = arith.divf %69, %70 : vector<16x128xf32>
    %72 = vector.extract_strided_slice %59 {offsets = [0, 256], sizes = [16, 128], strides = [1, 1]} : vector<16x512xf32> to vector<16x128xf32>
    %73 = math.tanh %72 : vector<16x128xf32>
    %74 = vector.extract_strided_slice %59 {offsets = [0, 384], sizes = [16, 128], strides = [1, 1]} : vector<16x512xf32> to vector<16x128xf32>
    %75 = arith.negf %74 : vector<16x128xf32>
    %76 = math.exp %75 : vector<16x128xf32>
    %cst_36 = arith.constant 1.000000e+00 : f32
    %77 = vector.broadcast %cst_36 : f32 to vector<16x128xf32>
    %78 = arith.addf %77, %76 : vector<16x128xf32>
    %79 = arith.divf %77, %78 : vector<16x128xf32>
    %80 = arith.mulf %71, %53 : vector<16x128xf32>
    %81 = arith.mulf %65, %73 : vector<16x128xf32>
    %82 = arith.addf %80, %81 : vector<16x128xf32>
    %83 = math.tanh %82 : vector<16x128xf32>
    %84 = arith.mulf %79, %83 : vector<16x128xf32>
    %c0_37 = arith.constant 0 : index
    %c0_38 = arith.constant 0 : index
    %85 = vector.load %arg8[%c0_37, %c0_38] : memref<16x128xf32, #tpu.memory_space<vmem>>, vector<16x128xf32>
    tpu.vector_store %arg8[%c0_37, %c0_38], %82 {strides = array<i32>} : memref<16x128xf32, #tpu.memory_space<vmem>>, vector<16x128xf32>,
    %c0_39 = arith.constant 0 : index
    %c0_40 = arith.constant 0 : index
    %86 = vector.load %arg7[%c0_39, %c0_40] : memref<16x128xf32, #tpu.memory_space<vmem>>, vector<16x128xf32>
    tpu.vector_store %arg7[%c0_39, %c0_40], %84 {strides = array<i32>} : memref<16x128xf32, #tpu.memory_space<vmem>>, vector<16x128xf32>,
    %87 = arith.truncf %84 : vector<16x128xf32> to vector<16x128xbf16>
    %88 = arith.index_cast %51 : i32 to index
    %c0_41 = arith.constant 0 : index
    %89 = vector.load %arg5[%88, %c0_41] : memref<64x128xbf16, #tpu.memory_space<vmem>>, vector<16x128xbf16>
    tpu.vector_store %arg5[%88, %c0_41], %87 {strides = array<i32>} : memref<64x128xbf16, #tpu.memory_space<vmem>>, vector<16x128xbf16>,
    %c2_i32 = arith.constant 2 : i32
    %c16_i32_42 = arith.constant 16 : i32
    %90 = arith.muli %c2_i32, %c16_i32_42 : i32
    %91 = tpu.assume_multiple %90, 16 : i32
    %c0_43 = arith.constant 0 : index
    %c0_44 = arith.constant 0 : index
    %92 = vector.load %arg7[%c0_43, %c0_44] : memref<16x128xf32, #tpu.memory_space<vmem>>, vector<16x128xf32>
    %c0_45 = arith.constant 0 : index
    %c0_46 = arith.constant 0 : index
    %93 = vector.load %arg8[%c0_45, %c0_46] : memref<16x128xf32, #tpu.memory_space<vmem>>, vector<16x128xf32>
    %94 = arith.index_cast %91 : i32 to index
    %c0_47 = arith.constant 0 : index
    %95 = vector.load %arg6[%94, %c0_47] : memref<64x512xf32, #tpu.memory_space<vmem>>, vector<16x512xf32>
    %96 = arith.truncf %92 : vector<16x128xf32> to vector<16x128xbf16>
    %c0_48 = arith.constant 0 : index
    %c0_49 = arith.constant 0 : index
    %97 = vector.load %arg3[%c0_48, %c0_49] : memref<128x512xbf16, #tpu.memory_space<vmem>>, vector<128x512xbf16>
    %cst_50 = arith.constant dense<0.000000e+00> : vector<16x512xf32>
    %98 = tpu.matmul %96, %97, %cst_50 {dimension_numbers = #tpu.dot_dimension_numbers<[1], [0], [0], [1], [0, 0, 1, 1], [], []>} : vector<16x128xbf16>, vector<128x512xbf16>, vector<16x512xf32> -> vector<16x512xf32>
    %99 = arith.addf %95, %98 : vector<16x512xf32>
    %100 = vector.extract_strided_slice %99 {offsets = [0, 0], sizes = [16, 128], strides = [1, 1]} : vector<16x512xf32> to vector<16x128xf32>
    %101 = arith.negf %100 : vector<16x128xf32>
    %102 = math.exp %101 : vector<16x128xf32>
    %cst_51 = arith.constant 1.000000e+00 : f32
    %103 = vector.broadcast %cst_51 : f32 to vector<16x128xf32>
    %104 = arith.addf %103, %102 : vector<16x128xf32>
    %105 = arith.divf %103, %104 : vector<16x128xf32>
    %106 = vector.extract_strided_slice %99 {offsets = [0, 128], sizes = [16, 128], strides = [1, 1]} : vector<16x512xf32> to vector<16x128xf32>
    %107 = arith.negf %106 : vector<16x128xf32>
    %108 = math.exp %107 : vector<16x128xf32>
    %cst_52 = arith.constant 1.000000e+00 : f32
    %109 = vector.broadcast %cst_52 : f32 to vector<16x128xf32>
    %110 = arith.addf %109, %108 : vector<16x128xf32>
    %111 = arith.divf %109, %110 : vector<16x128xf32>
    %112 = vector.extract_strided_slice %99 {offsets = [0, 256], sizes = [16, 128], strides = [1, 1]} : vector<16x512xf32> to vector<16x128xf32>
    %113 = math.tanh %112 : vector<16x128xf32>
    %114 = vector.extract_strided_slice %99 {offsets = [0, 384], sizes = [16, 128], strides = [1, 1]} : vector<16x512xf32> to vector<16x128xf32>
    %115 = arith.negf %114 : vector<16x128xf32>
    %116 = math.exp %115 : vector<16x128xf32>
    %cst_53 = arith.constant 1.000000e+00 : f32
    %117 = vector.broadcast %cst_53 : f32 to vector<16x128xf32>
    %118 = arith.addf %117, %116 : vector<16x128xf32>
    %119 = arith.divf %117, %118 : vector<16x128xf32>
    %120 = arith.mulf %111, %93 : vector<16x128xf32>
    %121 = arith.mulf %105, %113 : vector<16x128xf32>
    %122 = arith.addf %120, %121 : vector<16x128xf32>
    %123 = math.tanh %122 : vector<16x128xf32>
    %124 = arith.mulf %119, %123 : vector<16x128xf32>
    %c0_54 = arith.constant 0 : index
    %c0_55 = arith.constant 0 : index
    %125 = vector.load %arg8[%c0_54, %c0_55] : memref<16x128xf32, #tpu.memory_space<vmem>>, vector<16x128xf32>
    tpu.vector_store %arg8[%c0_54, %c0_55], %122 {strides = array<i32>} : memref<16x128xf32, #tpu.memory_space<vmem>>, vector<16x128xf32>,
    %c0_56 = arith.constant 0 : index
    %c0_57 = arith.constant 0 : index
    %126 = vector.load %arg7[%c0_56, %c0_57] : memref<16x128xf32, #tpu.memory_space<vmem>>, vector<16x128xf32>
    tpu.vector_store %arg7[%c0_56, %c0_57], %124 {strides = array<i32>} : memref<16x128xf32, #tpu.memory_space<vmem>>, vector<16x128xf32>,
    %127 = arith.truncf %124 : vector<16x128xf32> to vector<16x128xbf16>
    %128 = arith.index_cast %91 : i32 to index
    %c0_58 = arith.constant 0 : index
    %129 = vector.load %arg5[%128, %c0_58] : memref<64x128xbf16, #tpu.memory_space<vmem>>, vector<16x128xbf16>
    tpu.vector_store %arg5[%128, %c0_58], %127 {strides = array<i32>} : memref<64x128xbf16, #tpu.memory_space<vmem>>, vector<16x128xbf16>,
    %c3_i32 = arith.constant 3 : i32
    %c16_i32_59 = arith.constant 16 : i32
    %130 = arith.muli %c3_i32, %c16_i32_59 : i32
    %131 = tpu.assume_multiple %130, 16 : i32
    %c0_60 = arith.constant 0 : index
    %c0_61 = arith.constant 0 : index
    %132 = vector.load %arg7[%c0_60, %c0_61] : memref<16x128xf32, #tpu.memory_space<vmem>>, vector<16x128xf32>
    %c0_62 = arith.constant 0 : index
    %c0_63 = arith.constant 0 : index
    %133 = vector.load %arg8[%c0_62, %c0_63] : memref<16x128xf32, #tpu.memory_space<vmem>>, vector<16x128xf32>
    %134 = arith.index_cast %131 : i32 to index
    %c0_64 = arith.constant 0 : index
    %135 = vector.load %arg6[%134, %c0_64] : memref<64x512xf32, #tpu.memory_space<vmem>>, vector<16x512xf32>
    %136 = arith.truncf %132 : vector<16x128xf32> to vector<16x128xbf16>
    %c0_65 = arith.constant 0 : index
    %c0_66 = arith.constant 0 : index
    %137 = vector.load %arg3[%c0_65, %c0_66] : memref<128x512xbf16, #tpu.memory_space<vmem>>, vector<128x512xbf16>
    %cst_67 = arith.constant dense<0.000000e+00> : vector<16x512xf32>
    %138 = tpu.matmul %136, %137, %cst_67 {dimension_numbers = #tpu.dot_dimension_numbers<[1], [0], [0], [1], [0, 0, 1, 1], [], []>} : vector<16x128xbf16>, vector<128x512xbf16>, vector<16x512xf32> -> vector<16x512xf32>
    %139 = arith.addf %135, %138 : vector<16x512xf32>
    %140 = vector.extract_strided_slice %139 {offsets = [0, 0], sizes = [16, 128], strides = [1, 1]} : vector<16x512xf32> to vector<16x128xf32>
    %141 = arith.negf %140 : vector<16x128xf32>
    %142 = math.exp %141 : vector<16x128xf32>
    %cst_68 = arith.constant 1.000000e+00 : f32
    %143 = vector.broadcast %cst_68 : f32 to vector<16x128xf32>
    %144 = arith.addf %143, %142 : vector<16x128xf32>
    %145 = arith.divf %143, %144 : vector<16x128xf32>
    %146 = vector.extract_strided_slice %139 {offsets = [0, 128], sizes = [16, 128], strides = [1, 1]} : vector<16x512xf32> to vector<16x128xf32>
    %147 = arith.negf %146 : vector<16x128xf32>
    %148 = math.exp %147 : vector<16x128xf32>
    %cst_69 = arith.constant 1.000000e+00 : f32
    %149 = vector.broadcast %cst_69 : f32 to vector<16x128xf32>
    %150 = arith.addf %149, %148 : vector<16x128xf32>
    %151 = arith.divf %149, %150 : vector<16x128xf32>
    %152 = vector.extract_strided_slice %139 {offsets = [0, 256], sizes = [16, 128], strides = [1, 1]} : vector<16x512xf32> to vector<16x128xf32>
    %153 = math.tanh %152 : vector<16x128xf32>
    %154 = vector.extract_strided_slice %139 {offsets = [0, 384], sizes = [16, 128], strides = [1, 1]} : vector<16x512xf32> to vector<16x128xf32>
    %155 = arith.negf %154 : vector<16x128xf32>
    %156 = math.exp %155 : vector<16x128xf32>
    %cst_70 = arith.constant 1.000000e+00 : f32
    %157 = vector.broadcast %cst_70 : f32 to vector<16x128xf32>
    %158 = arith.addf %157, %156 : vector<16x128xf32>
    %159 = arith.divf %157, %158 : vector<16x128xf32>
    %160 = arith.mulf %151, %133 : vector<16x128xf32>
    %161 = arith.mulf %145, %153 : vector<16x128xf32>
    %162 = arith.addf %160, %161 : vector<16x128xf32>
    %163 = math.tanh %162 : vector<16x128xf32>
    %164 = arith.mulf %159, %163 : vector<16x128xf32>
    %c0_71 = arith.constant 0 : index
    %c0_72 = arith.constant 0 : index
    %165 = vector.load %arg8[%c0_71, %c0_72] : memref<16x128xf32, #tpu.memory_space<vmem>>, vector<16x128xf32>
    tpu.vector_store %arg8[%c0_71, %c0_72], %162 {strides = array<i32>} : memref<16x128xf32, #tpu.memory_space<vmem>>, vector<16x128xf32>,
    %c0_73 = arith.constant 0 : index
    %c0_74 = arith.constant 0 : index
    %166 = vector.load %arg7[%c0_73, %c0_74] : memref<16x128xf32, #tpu.memory_space<vmem>>, vector<16x128xf32>
    tpu.vector_store %arg7[%c0_73, %c0_74], %164 {strides = array<i32>} : memref<16x128xf32, #tpu.memory_space<vmem>>, vector<16x128xf32>,
    %167 = arith.truncf %164 : vector<16x128xf32> to vector<16x128xbf16>
    %168 = arith.index_cast %131 : i32 to index
    %c0_75 = arith.constant 0 : index
    %169 = vector.load %arg5[%168, %c0_75] : memref<64x128xbf16, #tpu.memory_space<vmem>>, vector<16x128xbf16>
    tpu.vector_store %arg5[%168, %c0_75], %167 {strides = array<i32>} : memref<64x128xbf16, #tpu.memory_space<vmem>>, vector<16x128xbf16>,
    %c4_i32 = arith.constant 4 : i32
    return
  }
  func.func @transform_0(%arg0: i32) -> (i32, i32) {
    %c0_i32 = arith.constant 0 : i32
    %c0_i32_0 = arith.constant 0 : i32
    return %arg0, %c0_i32 : i32, i32
  }
  func.func @transform_1(%arg0: i32) -> (i32, i32) {
    %c0_i32 = arith.constant 0 : i32
    %c0_i32_0 = arith.constant 0 : i32
    %c0_i32_1 = arith.constant 0 : i32
    return %c0_i32, %c0_i32_0 : i32, i32
  }
  func.func @transform_2(%arg0: i32) -> (i32, i32) {
    %c0_i32 = arith.constant 0 : i32
    %c0_i32_0 = arith.constant 0 : i32
    %c0_i32_1 = arith.constant 0 : i32
    return %c0_i32, %c0_i32_0 : i32, i32
  }
  func.func @transform_3(%arg0: i32) -> (i32, i32) {
    %c0_i32 = arith.constant 0 : i32
    %c0_i32_0 = arith.constant 0 : i32
    %c0_i32_1 = arith.constant 0 : i32
    return %c0_i32, %c0_i32_0 : i32, i32
  }
  func.func @transform_4(%arg0: i32) -> (i32, i32) {
    %c0_i32 = arith.constant 0 : i32
    %c0_i32_0 = arith.constant 0 : i32
    return %arg0, %c0_i32 : i32, i32
  }
}

</mosaic_0001>

<bundles_post_ra>
// kernel: tpu_custom_call.1
= control target key start
LH: loop header
LB: loop body
LE: loop exit
PB: predicated region body
PF: predicated region fallthrough
CT: control target
= control target key end

     0   :  { %9 = vsyncpa [#allocation6], 0  ;;  %s3162_s0 = inlined_call_operand.vmem [shape: bf16[128,16], index: 0, kind: input, shape index: {}]   ;;  %s3163_s1 = inlined_call_operand.vmem [shape: bf16[16,512], index: 1, kind: input, shape index: {}]   ;;  %s3164_s2 = inlined_call_operand.hbm [shape: bf16[128,512], index: 2, kind: input, shape index: {}]   ;;  %s3165_s3 = inlined_call_operand.vmem [shape: f32[1,512], index: 3, kind: input, shape index: {}]   ;;  %s3166_s4 = inlined_call_operand.hbm [shape: bf16[128,128], index: 4, kind: output, shape index: {}]  }
   0x1   :  { %10 = vsyncpa [#allocation7], 0 }
   0x2   :  { %12 = vsyncpa [#allocation7 + $0x1], 0  ;;  %s2726_s15 = smov 0   ;;  %s2728_s16 = smov 0  }
   0x3   :  { %s2730_s17 = smov 0   ;;  %s2732_s18 = smov 0  }
   0x4 LB: > { %s2747_s19 = sadd.s32 4294967295, %s2691_s18   ;;  %s2038_s20 = sadd.s32 4294967294, %s2691_s18   ;;  %s2691_s18 = sphi %s2732_s18, %s3183_s18   ;;  %s2687_s17 = sphi %s2730_s17, %s3182_s17   ;;  %s2683_s16 = sphi %s2728_s16, %s3181_s16   ;;  %s2679_s15 = sphi %s2726_s15, %s3180_s15  }
   0x5   : > { %s2751_s21 = sadd.s32 1, %s2691_s18   ;;  %s114_s22 = sadd.s32 1, %s2687_s17 }
   0x6   : > { %s111_s23 = ssub.s32 %s2691_s18, %s2751_s21  ;;  %p124_p0 = scmp.ne.s32.totalorder %s2687_s17, %s2683_s16 }
   0x7   : > { %p112_p1 = scmp.eq.s32.totalorder %s111_s23, 0  ;;  %p125_p2 = scmp.eq.s32.totalorder %s2747_s19, 1 }
   0x8   : > { %p130_p3 = scmp.ne.s32.totalorder %s2683_s16, %s2679_s15  ;;  %p131_p4 = scmp.eq.s32.totalorder %s2038_s20, 1 }
   0x9   : > { %s2762_s24 = scalar_select %p112_p1, %s2687_s17, %s114_s22  }
   0xa   : > { %p2764_p5 = por %p125_p2, %p124_p0  ;;  %p2768_p6 = por %p131_p4, %p130_p3 }
   0xb   : > { %p2039_p7 = scmp.ge.s32.totalorder %s2691_s18, 1  ;;  %p138_p8 = scmp.lt.s32.totalorder %s2691_s18, 3 }
   0xc   : > { %s3170_s25 = scalar_select %p2764_p5, 1, 0 }
   0xd   : > { %s3171_s26 = scalar_select %p2768_p6, 1, 0 }
   0xe   : > { %p3167_p10 = scmp.eq.s32.totalorder %s2747_s19, 0  ;;  %p2776_p11 = pnand %p2039_p7, %p138_p8 }
   0xf   : > { %s2693_s28 = smov [#allocation5]   ;;  %s2597_s7 = scalar_lea.hbm %s3164_s2, 4096 }
  0x10   : > { %s3172_s27 = scalar_select %p2776_p11, 1, 0 }
  0x11   : > { %s153_s29 = sshll.u32 %s2693_s28, 4  ;;  %p2337_p12 = pneg %p2776_p11  ;;  %s154_s29 = int_to_ptr.vmem [resolvable:$true] %s153_s29 }
  0x12   : > { %p2598_p0 = scmp.ne.s32.totalorder %s3164_s2, %s2597_s7  ;;  %p2604_p4 = scmp.lt.u32.totalorder %s2597_s7, %s3164_s2 }
  0x13   : > { %p2784_p13 = pnand %p3167_p10, %p2337_p12 }
  0x15   : > { %p2599_p1 = pneg %p2784_p13 }
  0x17   : > { %p2600_p2 = pnand %p2599_p1, %p2598_p0 }
  0x19   : > { %p2601_p3 = pneg %p2600_p2 }
  0x1b   : > { %p2606_p7 = pnand %p2604_p4, %p2601_p3 }
  0x1d   : > { %2609 = shalt.err (!%p2606_p7)
}
  0x1e   : > { %s2610_s12 = scalar_lea.vmem %s154_s29, 4096  ;;  %p2618_p10 = scmp.lt.s32.totalorder %s154_s29, %s154_s29 }
  0x1f   : > { %p2611_p8 = scmp.ne.s32.totalorder %s154_s29, %s2610_s12  ;;  %p2619_p6 = scmp.lt.s32.totalorder %s2610_s12, %s2610_s12 }
  0x21   : > { %p2613_p12 = pnand %p2611_p8, %p2599_p1  ;;  %p2620_p5 = por %p2619_p6, %p2618_p10 }
  0x23   : > { %p2614_p9 = pneg %p2613_p12 }
  0x25   : > { %p2621_p11 = pnand %p2620_p5, %p2614_p9 }
  0x27   : > { %2624 = shalt.err (!%p2621_p11)
}
  0x28   : > { %s2694_s13 = smov 256   ;;  %s2695_s14 = smov 16  }
  0x29   : > { %2340 = dma.hbm_to_vmem [thread:$0]  (!%p2784_p13), %s3164_s2, 4096, %s154_s29, [#allocation6], %s2694_s13, %s2694_s13, %s2695_s14  }
  0x2a   : > { %p3174_p0 = scmp.ne.s32.totalorder %s3172_s27, 0 }
  0x2b   : > { %p3175_p2 = scmp.eq.s32.totalorder (!%p3174_p0), %s2747_s19, 0 }
  0x2c   : > { %181 = sbr.rel (%p3174_p0) target bundleno = 1168 (0x490), region = 36 }
  0x33   : > { %2670 = dma.done.wait (%p3175_p2), [#allocation6], 4096   ;;  %p3176_p1 = pmov %p3175_p2 }
  0x34   : > { %s204_s23 = sand.u32 1, %s2683_s16   ;;  %s2045_s28 = sshll.u32 %s2747_s19, 3 }
  0x35   : > { %2672 = vsyncadd (%p3176_p1), [#allocation6], 4294963200  ;;  %s2044_s30 = sshll.u32 %s204_s23, 5  ;;  %p208_p5 = scmp.lt.s32.totalorder %s2045_s28, 15 }
  0x36   : > { %s2819_s7 = scalar_lea.vmem [#allocation8], %s2044_s30  ;;  %p3177_p6 = scmp.ne.s32.totalorder %s2747_s19, 0 }
  0x37   : > { %s3185_s28 = smov (!%p208_p5, %s2045_s28), 15  ;;  %v2696_v0 = vmov (!%p3177_p6), 0.0  }
  0x38   : > { %s2046_s5 = sshll.u32 %s3185_s28, 2  ;;  %218 = sbr.rel (%p3177_p6) target bundleno = 63 (0x3f), region = 44  ;;  %219 = vst [vmem:[#allocation3] sm:$0xff] (!%p3177_p6), %v2696_v0  ;;  %220 = vst [vmem:[#allocation3 + $0x8] sm:$0xff] (!%p3177_p6), %v2696_v0 }
  0x39   : > { %s2817_s27 = scalar_lea.vmem %s3162_s0, %s2046_s5  ;;  %221 = vst [vmem:[#allocation4] sm:$0xff] (!%p3177_p6), %v2696_v0  ;;  %222 = vst [vmem:[#allocation4 + $0x8] sm:$0xff] (!%p3177_p6), %v2696_v0 }
  0x3f PF: > { %v2387_v1 = vld [vmem:[%s3163_s1 + $0x4] ss:$16 sps:$4 sm:$0xff]   ;;  %v2389_v2 = vld [vmem:[%s3163_s1 + $0xc] ss:$16 sps:$4 sm:$0xff]   ;;  %v2697_v3 = vmov 0   ;;  %vm297_vm0 = vcmask 130048   ;;  %v237_v45 = vlaneseq }
  0x40   : > { %342 = vmatprep.mubr.bf16.mxu0 %v2697_v3  ;;  %415 = vmatprep.mubr.bf16.mxu1 %v2697_v3  ;;  %v2391_v4 = vld [vmem:[%s3163_s1] ss:$16 sps:$4 sm:$0xff]   ;;  %v2392_v5 = vld [vmem:[%s3163_s1 + $0x8] ss:$16 sps:$4 sm:$0xff]   ;;  %v2840_v8 = vld [vmem:[#allocation5 + $0x4] ss:$16 sps:$4 sm:$0xff]  }
  0x41   : > { %310 = vmatprep.subr.bf16.mxu0 %v2387_v1  ;;  %383 = vmatprep.subr.bf16.mxu1 %v2389_v2  ;;  %v2393_v6 = vld [vmem:[%s2817_s27] sm:$0xff]   ;;  %v2842_v9 = vld [vmem:[#allocation5 + $0x8] ss:$16 sps:$4 sm:$0xff]   ;;  %v2845_v10 = vld [vmem:[#allocation5 + $0xc] ss:$16 sps:$4 sm:$0xff]   ;;  %v238_v46 = vshrl.u32 %v237_v45, 7 }
  0x42   : > { %311 = vmatpush1.bf16.msra.mxu0 %v2391_v4  ;;  %384 = vmatpush1.bf16.msra.mxu1 %v2392_v5  ;;  %v2838_v7 = vld [vmem:[#allocation5] ss:$16 sps:$4 sm:$0xff]   ;;  %v2849_v11 = vld [vmem:[#allocation5 + $0x24] ss:$16 sps:$4 sm:$0xff]   ;;  %v2855_v13 = vld [vmem:[#allocation5 + $0x2c] ss:$16 sps:$4 sm:$0xff]  }
  0x43   : > { %696 = vmatprep.subr.bf16.mxu0 %v2840_v8  ;;  %739 = vmatprep.subr.bf16.mxu1 %v2845_v10  ;;  %v2853_v12 = vld [vmem:[#allocation5 + $0x20] ss:$16 sps:$4 sm:$0xff]   ;;  %v2859_v14 = vld [vmem:[#allocation5 + $0x28] ss:$16 sps:$4 sm:$0xff]   ;;  %v2865_v16 = vld [vmem:[#allocation5 + $0x44] ss:$16 sps:$4 sm:$0xff]  }
  0x44   : > { %v2406_v15 = vld [vmem:[%s2817_s27 + $0x8] sm:$0xff]   ;;  %v2868_v17 = vld [vmem:[#allocation5 + $0x40] ss:$16 sps:$4 sm:$0xff]   ;;  %v2876_v20 = vld [vmem:[#allocation5 + $0x64] ss:$16 sps:$4 sm:$0xff]   ;;  %v239_v47 = vsub.s32 0, %v238_v46 }
  0x45   : > { %2056 = vmatmul.mubr.msk.bf16.vlgmr.msra.gmra.mrb[0].mxu0 %vm297_vm0, %v2393_v6  ;;  %2060 = vmatmul.mubr.msk.bf16.vlgmr.msra.gmra.mrb[0].mxu1 %vm297_vm0, %v2393_v6  ;;  %v2870_v18 = vld [vmem:[#allocation5 + $0x4c] ss:$16 sps:$4 sm:$0xff]   ;;  %v2874_v19 = vld [vmem:[#allocation5 + $0x48] ss:$16 sps:$4 sm:$0xff]   ;;  %v2884_v22 = vld [vmem:[#allocation5 + $0x60] ss:$16 sps:$4 sm:$0xff]  }
  0x46   : > { %697 = vmatpush1.bf16.msra.mxu0 %v2838_v7  ;;  %740 = vmatpush1.bf16.msra.mxu1 %v2842_v9  ;;  %v2881_v21 = vld [vmem:[#allocation5 + $0x6c] ss:$16 sps:$4 sm:$0xff]   ;;  %v2889_v23 = vld [vmem:[#allocation5 + $0x68] ss:$16 sps:$4 sm:$0xff]   ;;  %v2891_v24 = vld [vmem:[#allocation5 + $0x84] ss:$16 sps:$4 sm:$0xff]  }
  0x47   : > { %698 = vmatprep.subr.bf16.mxu0 %v2849_v11  ;;  %741 = vmatprep.subr.bf16.mxu1 %v2855_v13  ;;  %v2895_v25 = vld [vmem:[#allocation5 + $0x8c] ss:$16 sps:$4 sm:$0xff]   ;;  %v2419_v26 = vld [vmem:[%s2817_s27 + $0x10] sm:$0xff]   ;;  %v2903_v28 = vld [vmem:[#allocation5 + $0x88] ss:$16 sps:$4 sm:$0xff]   ;;  %v243_v49 = vsub.s32 1, %v238_v46 }
  0x48   : > { %352 = vmatprep.mubr.bf16.mxu0 %v2697_v3  ;;  %425 = vmatprep.mubr.bf16.mxu1 %v2697_v3  ;;  %v2899_v27 = vld [vmem:[#allocation5 + $0x80] ss:$16 sps:$4 sm:$0xff]   ;;  %v2905_v29 = vld [vmem:[#allocation5 + $0xa4] ss:$16 sps:$4 sm:$0xff]   ;;  %v2908_v30 = vld [vmem:[#allocation5 + $0xac] ss:$16 sps:$4 sm:$0xff]  }
  0x49   : > { %v2912_v31 = vld [vmem:[#allocation5 + $0xa0] ss:$16 sps:$4 sm:$0xff]   ;;  %v2915_v32 = vld [vmem:[#allocation5 + $0xa8] ss:$16 sps:$4 sm:$0xff]   ;;  %v2920_v33 = vld [vmem:[#allocation5 + $0xc4] ss:$16 sps:$4 sm:$0xff]  }
  0x4a   : > { %699 = vmatpush1.bf16.msra.mxu0 %v2853_v12  ;;  %742 = vmatpush1.bf16.msra.mxu1 %v2859_v14  ;;  %v2924_v34 = vld [vmem:[#allocation5 + $0xcc] ss:$16 sps:$4 sm:$0xff]   ;;  %v2927_v36 = vld [vmem:[#allocation5 + $0xc0] ss:$16 sps:$4 sm:$0xff]   ;;  %v2930_v37 = vld [vmem:[#allocation5 + $0xc8] ss:$16 sps:$4 sm:$0xff]  }
  0x4b   : > { %700 = vmatprep.subr.bf16.mxu0 %v2865_v16  ;;  %743 = vmatprep.subr.bf16.mxu1 %v2870_v18  ;;  %v2432_v35 = vld [vmem:[%s2817_s27 + $0x18] sm:$0xff]   ;;  %v2932_v38 = vld [vmem:[#allocation5 + $0xe4] ss:$16 sps:$4 sm:$0xff]   ;;  %v2939_v40 = vld [vmem:[#allocation5 + $0xe0] ss:$16 sps:$4 sm:$0xff]   ;;  %v251_v53 = vsub.s32 3, %v238_v46 }
  0x4c   : > { %v2934_v39 = vld [vmem:[#allocation5 + $0xec] ss:$16 sps:$4 sm:$0xff]   ;;  %v488_v41 = vld [vmem:[#allocation3] sm:$0xff]  ;;  %v2943_v43 = vld [vmem:[#allocation5 + $0xe8] ss:$16 sps:$4 sm:$0xff]   ;;  %v247_v61 = vsub.s32 2, %v238_v46 }
  0x4d   : > { %2057 = vmatmul.mubr.msk.bf16.gmra.mrb[4].mxu0 %vm297_vm0, %v2406_v15  ;;  %2061 = vmatmul.mubr.msk.bf16.gmra.mrb[4].mxu1 %vm297_vm0, %v2406_v15  ;;  %v489_v42 = vld [vmem:[#allocation3 + $0x8] sm:$0xff]  ;;  %v235_v48 = vld [vmem:[%s3165_s3] sm:$0xf]  ;;  %s2243_s30 = sshll.u32 %s2747_s19, 9  ;;  %s1961_s5 = sshll.u32 %s2819_s7, 4  ;;  %s3116_s5 = int_to_ptr.vmem [resolvable:$true] %s1961_s5 }
  0x4e   : > { %701 = vmatpush1.bf16.msra.mxu0 %v2868_v17  ;;  %362 = vmatprep.mubr.bf16.mxu0 %v2697_v3  ;;  %v503_v44 = vpack.c.bf16 %v489_v42, %v488_v41  ;;  %v2992_v50 = vrot.slane %v235_v48, %v239_v47  ;;  %v2994_v51 = vrot.slane %v235_v48, %v243_v49  ;;  %s3114_s27 = scalar_lea.hbm %s3166_s4, %s2243_s30  ;;  %s3121_s8 = scalar_lea.sflag [#allocation7], %s204_s23 }
  0x4f   : > { %744 = vmatpush1.bf16.msra.mxu1 %v2874_v19  ;;  %702 = vmatprep.subr.bf16.mxu0 %v2876_v20  ;;  %v2999_v2 = vrot.slane %v235_v48, %v251_v53  ;;  %s2625_s19 = scalar_lea.vmem %s3116_s5, 512  ;;  %p3178_p10 = scmp.ne.s32.totalorder %s3170_s25, 0 }
  0x50   : > { %745 = vmatprep.subr.bf16.mxu1 %v2881_v21  ;;  %435 = vmatprep.mubr.bf16.mxu1 %v2697_v3  ;;  %p2626_p9 = scmp.ne.s32.totalorder %s3116_s5, %s2625_s19  ;;  %s2698_s9 = smov [#allocation8]  }
  0x51   : > { %s2629_s10 = sshll.u32 %s2698_s9, 4  ;;  %s2630_s10 = int_to_ptr.vmem [resolvable:$false] %s2629_s10 }
  0x52   : > { %703 = vmatpush1.bf16.msra.mxu0 %v2884_v22  ;;  %p2627_p11 = pnand %p2626_p9, %p3178_p10  ;;  %s2631_s11 = scalar_lea.vmem %s2630_s10, 1024 }
  0x53   : > { %746 = vmatpush1.bf16.msra.mxu1 %v2889_v23  ;;  %704 = vmatprep.subr.bf16.mxu0 %v2891_v24  ;;  %p2632_p3 = scmp.lt.s32.totalorder %s3116_s5, %s2630_s10  ;;  %p2633_p4 = scmp.lt.s32.totalorder %s2631_s11, %s2625_s19 }
  0x54   : > { %747 = vmatprep.subr.bf16.mxu1 %v2895_v25  ;;  %p2628_p13 = pneg %p2627_p11 }
  0x55   : > { %2058 = vmatmul.mubr.msk.bf16.gmra.mrb[8].mxu0 %vm297_vm0, %v2419_v26  ;;  %2062 = vmatmul.mubr.msk.bf16.gmra.mrb[8].mxu1 %vm297_vm0, %v2419_v26  ;;  %p2634_p7 = por %p2633_p4, %p2632_p3 }
  0x56   : > { %705 = vmatpush1.bf16.msra.mxu0 %v2899_v27  ;;  %372 = vmatprep.mubr.bf16.mxu0 %v2697_v3 }
  0x57   : > { %748 = vmatpush1.bf16.msra.mxu1 %v2903_v28  ;;  %706 = vmatprep.subr.bf16.mxu0 %v2905_v29  ;;  %p2635_p8 = pnand %p2634_p7, %p2628_p13 }
  0x58   : > { %749 = vmatprep.subr.bf16.mxu1 %v2908_v30  ;;  %445 = vmatprep.mubr.bf16.mxu1 %v2697_v3 }
  0x5a   : > { %707 = vmatpush1.bf16.msra.mxu0 %v2912_v31 }
  0x5b   : > { %750 = vmatpush1.bf16.msra.mxu1 %v2915_v32  ;;  %708 = vmatprep.subr.bf16.mxu0 %v2920_v33 }
  0x5c   : > { %751 = vmatprep.subr.bf16.mxu1 %v2924_v34 }
  0x5d   : > { %2059 = vmatmul.mubr.msk.bf16.gmra.mrb[12].mxu0 %vm297_vm0, %v2432_v35  ;;  %2063 = vmatmul.mubr.msk.bf16.gmra.mrb[12].mxu1 %vm297_vm0, %v2432_v35 }
  0x5e   : > { %709 = vmatpush1.bf16.msra.mxu0 %v2927_v36  ;;  %728 = vmatprep.mubr.bf16.mxu0 %v2697_v3 }
  0x5f   : > { %752 = vmatpush1.bf16.msra.mxu1 %v2930_v37  ;;  %710 = vmatprep.subr.bf16.mxu0 %v2932_v38 }
  0x60   : > { %753 = vmatprep.subr.bf16.mxu1 %v2934_v39  ;;  %771 = vmatprep.mubr.bf16.mxu1 %v2697_v3 }
  0x62   : > { %711 = vmatpush1.bf16.msra.mxu0 %v2939_v40 }
  0x63   : > { %754 = vmatpush1.bf16.msra.mxu1 %v2943_v43  ;;  %1060 = vmatprep.subr.bf16.mxu0 %v2840_v8 }
  0x64   : > { %1103 = vmatprep.subr.bf16.mxu1 %v2845_v10 }
  0x65   : > { %729 = vmatmul.mubr.bf16.vlgmr.msra.gmra.mrb[0].mxu0 %v503_v44 }
  0x66   : > { %772 = vmatmul.mubr.bf16.vlgmr.msra.gmra.mrb[0].mxu1 %v503_v44  ;;  %1061 = vmatpush1.bf16.msra.mxu0 %v2838_v7 }
  0x67   : > { %1104 = vmatpush1.bf16.msra.mxu1 %v2842_v9  ;;  %1062 = vmatprep.subr.bf16.mxu0 %v2849_v11 }
  0x68   : > { %1105 = vmatprep.subr.bf16.mxu1 %v2855_v13  ;;  %1092 = vmatprep.mubr.bf16.mxu0 %v2697_v3 }
  0x69   : > { %1135 = vmatprep.mubr.bf16.mxu1 %v2697_v3 }
  0x6a   : > { %1063 = vmatpush1.bf16.msra.mxu0 %v2853_v12 }
  0x6b   : > { %1106 = vmatpush1.bf16.msra.mxu1 %v2859_v14  ;;  %1064 = vmatprep.subr.bf16.mxu0 %v2865_v16 }
  0x6c   : > { %1107 = vmatprep.subr.bf16.mxu1 %v2870_v18 }
  0x6e   : > { %1065 = vmatpush1.bf16.msra.mxu0 %v2868_v17 }
  0x6f   : > { %1108 = vmatpush1.bf16.msra.mxu1 %v2874_v19  ;;  %1066 = vmatprep.subr.bf16.mxu0 %v2876_v20 }
  0x70   : > { %1109 = vmatprep.subr.bf16.mxu1 %v2881_v21 }
  0x72   : > { %1067 = vmatpush1.bf16.msra.mxu0 %v2884_v22 }
  0x73   : > { %1110 = vmatpush1.bf16.msra.mxu1 %v2889_v23  ;;  %1068 = vmatprep.subr.bf16.mxu0 %v2891_v24 }
  0x74   : > { %1111 = vmatprep.subr.bf16.mxu1 %v2895_v25 }
  0x76   : > { %1069 = vmatpush1.bf16.msra.mxu0 %v2899_v27 }
  0x77   : > { %1112 = vmatpush1.bf16.msra.mxu1 %v2903_v28  ;;  %1070 = vmatprep.subr.bf16.mxu0 %v2905_v29 }
  0x78   : > { %1113 = vmatprep.subr.bf16.mxu1 %v2908_v30 }
  0x7a   : > { %1071 = vmatpush1.bf16.msra.mxu0 %v2912_v31 }
  0x7b   : > { %1114 = vmatpush1.bf16.msra.mxu1 %v2915_v32  ;;  %1072 = vmatprep.subr.bf16.mxu0 %v2920_v33 }
  0x7c   : > { %1115 = vmatprep.subr.bf16.mxu1 %v2924_v34 }
  0x7e   : > { %1073 = vmatpush1.bf16.msra.mxu0 %v2927_v36 }
  0x7f   : > { %1116 = vmatpush1.bf16.msra.mxu1 %v2930_v37  ;;  %1074 = vmatprep.subr.bf16.mxu0 %v2932_v38 }
  0x80   : > { %1117 = vmatprep.subr.bf16.mxu1 %v2934_v39 }
  0x82   : > { %1075 = vmatpush1.bf16.msra.mxu0 %v2939_v40 }
  0x83   : > { %1118 = vmatpush1.bf16.msra.mxu1 %v2943_v43  ;;  %1425 = vmatprep.subr.bf16.mxu0 %v2840_v8 }
  0x84   : > { %1468 = vmatprep.subr.bf16.mxu1 %v2845_v10  ;;  %v3002_v10 = vrot.slane %v235_v48, %v247_v61 }
 0x138   : > { %v730_v52 = vpop.f32.mrb[0].mxu0 }
 0x139   : > { %v2267_v54 = vadd.f32 %v730_v52, %v2992_v50  ;;  %v773_v55 = vpop.f32.mrb[0].mxu1  ;;  %v732_v56 = vpop.f32.mrb[1].mxu0 }
 0x13a   : > { %v2268_v57 = vadd.f32 %v732_v56, %v2994_v51  ;;  %v775_v58 = vpop.f32.mrb[1].mxu1  ;;  %v734_v59 = vpop.f32.mrb[2].mxu0  ;;  %v2283_v26 = vadd.f32 %v773_v55, %v3002_v10 }
 0x13b   : > { %v2096_v60 = vmul.f32 -1.442695, %v2267_v54  ;;  %v2269_v62 = vadd.f32 %v734_v59, %v2992_v50  ;;  %v777_v63 = vpop.f32.mrb[2].mxu1  ;;  %v736_v0 = vpop.f32.mrb[3].mxu0  ;;  %v2284_v15 = vadd.f32 %v775_v58, %v2999_v2  ;;  %v490_v58 = vld [vmem:[#allocation4] sm:$0xff] }
 0x13c   : > { %v2098_v1 = vmul.f32 -1.442695, %v2268_v57  ;;  %v2270_v4 = vadd.f32 %v736_v0, %v2994_v51  ;;  %v779_v5 = vpop.f32.mrb[3].mxu1  ;;  %v2285_v42 = vadd.f32 %v777_v63, %v3002_v10 }
 0x13d   : > { %2469 = vpow2.f32 %v2096_v60  ;;  %v2097_v6 = vmul.f32 -1.442695, %v2269_v62  ;;  %v2100_v35 = vmul.f32 -1.442695, %v2284_v15  ;;  %v2286_v41 = vadd.f32 %v779_v5, %v2999_v2 }
 0x13e   : > { %2471 = vpow2.f32 %v2098_v1  ;;  %v2099_v8 = vmul.f32 -1.442695, %v2270_v4  ;;  %v491_v4 = vld [vmem:[#allocation4 + $0x8] sm:$0xff] }
 0x13f   : > { %2473 = vpow2.f32 %v2097_v6  ;;  %v2101_v47 = vmul.f32 -1.442695, %v2286_v41 }
 0x140   : > { %2475 = vpow2.f32 %v2099_v8 }
 0x141   : > { %2477 = vtanh.f32 %v2283_v26 }
 0x142   : > { %2479 = vpow2.f32 %v2100_v35 }
 0x143   : > { %2481 = vtanh.f32 %v2285_v42 }
 0x147   : > { %v2470_v44 = vpop.eup %2469 }
 0x148   : > { %v2472_v45 = vpop.eup %2471  ;;  %v796_v46 = vadd.f32 1.0, %v2470_v44 }
 0x149   : > { %v808_v49 = vadd.f32 1.0, %v2472_v45  ;;  %v2474_v48 = vpop.eup %2473 }
 0x14a   : > { %2483 = vrcp.f32 %v796_v46  ;;  %v797_v52 = vadd.f32 1.0, %v2474_v48  ;;  %v2476_v53 = vpop.eup %2475 }
 0x14b   : > { %2485 = vrcp.f32 %v808_v49  ;;  %v809_v54 = vadd.f32 1.0, %v2476_v53  ;;  %v2478_v55 = vpop.eup %2477 }
 0x14c   : > { %2487 = vpow2.f32 %v2101_v47  ;;  %v2480_v56 = vpop.eup %2479 }
 0x14d   : > { %2489 = vrcp.f32 %v797_v52  ;;  %v2482_v57 = vpop.eup %2481  ;;  %v822_v1 = vadd.f32 1.0, %v2480_v56 }
 0x14e   : > { %2491 = vrcp.f32 %v809_v54 }
 0x14f   : > { %2493 = vrcp.f32 %v822_v1 }
 0x154   : > { %v2484_v59 = vpop.eup %2483 }
 0x155   : > { %v2486_v60 = vpop.eup %2485  ;;  %v830_v61 = vmul.f32 %v2484_v59, %v2478_v55 }
 0x156   : > { %v2488_v62 = vpop.eup %2487  ;;  %v828_v63 = vmul.f32 %v2486_v60, %v490_v58 }
 0x157   : > { %v2490_v0 = vpop.eup %2489  ;;  %v823_v15 = vadd.f32 1.0, %v2488_v62 }
 0x158   : > { %v3008_v5 = vadd.f32 %v830_v61, %v828_v63  ;;  %v831_v6 = vmul.f32 %v2490_v0, %v2482_v57  ;;  %v2492_v8 = vpop.eup %2491 }
 0x159   : > { %v829_v26 = vmul.f32 %v2492_v8, %v491_v4  ;;  %v2494_v41 = vpop.eup %2493 }
 0x15a   : > { %2495 = vtanh.f32 %v3008_v5 }
 0x15b   : > { %v3011_v35 = vadd.f32 %v831_v6, %v829_v26  ;;  %2497 = vrcp.f32 %v823_v15 }
 0x15d   : > { %2499 = vtanh.f32 %v3011_v35 }
 0x164   : > { %v2496_v42 = vpop.eup %2495 }
 0x165   : > { %v2498_v44 = vpop.eup %2497  ;;  %v836_v46 = vmul.f32 %v2496_v42, %v2494_v41 }
 0x167   : > { %v2500_v45 = vpop.eup %2499 }
 0x168   : > { %v837_v47 = vmul.f32 %v2500_v45, %v2498_v44 }
 0x16a   : > { %v2247_v49 = vpack.c.bf16 %v837_v47, %v836_v46 }
 0x16c   : > { %2248 = vst [vmem:[%s2819_s7] sm:$0xff] %v2247_v49   ;;  %1093 = vmatmul.mubr.bf16.vlgmr.msra.gmra.mrb[4].mxu0 %v2247_v49  ;;  %1136 = vmatmul.mubr.bf16.vlgmr.msra.gmra.mrb[4].mxu1 %v2247_v49 }
 0x16d   : > { %1426 = vmatpush1.bf16.msra.mxu0 %v2838_v7  ;;  %1469 = vmatpush1.bf16.msra.mxu1 %v2842_v9 }
 0x16e   : > { %1427 = vmatprep.subr.bf16.mxu0 %v2849_v11  ;;  %1470 = vmatprep.subr.bf16.mxu1 %v2855_v13 }
 0x16f   : > { %1457 = vmatprep.mubr.bf16.mxu0 %v2697_v3  ;;  %1500 = vmatprep.mubr.bf16.mxu1 %v2697_v3 }
 0x171   : > { %1428 = vmatpush1.bf16.msra.mxu0 %v2853_v12  ;;  %1471 = vmatpush1.bf16.msra.mxu1 %v2859_v14 }
 0x172   : > { %1429 = vmatprep.subr.bf16.mxu0 %v2865_v16  ;;  %1472 = vmatprep.subr.bf16.mxu1 %v2870_v18 }
 0x175   : > { %1430 = vmatpush1.bf16.msra.mxu0 %v2868_v17  ;;  %1473 = vmatpush1.bf16.msra.mxu1 %v2874_v19 }
 0x176   : > { %1431 = vmatprep.subr.bf16.mxu0 %v2876_v20  ;;  %1474 = vmatprep.subr.bf16.mxu1 %v2881_v21 }
 0x179   : > { %1432 = vmatpush1.bf16.msra.mxu0 %v2884_v22  ;;  %1475 = vmatpush1.bf16.msra.mxu1 %v2889_v23 }
 0x17a   : > { %1433 = vmatprep.subr.bf16.mxu0 %v2891_v24  ;;  %1476 = vmatprep.subr.bf16.mxu1 %v2895_v25 }
 0x17d   : > { %1434 = vmatpush1.bf16.msra.mxu0 %v2899_v27  ;;  %1477 = vmatpush1.bf16.msra.mxu1 %v2903_v28 }
 0x17e   : > { %1435 = vmatprep.subr.bf16.mxu0 %v2905_v29  ;;  %1478 = vmatprep.subr.bf16.mxu1 %v2908_v30 }
 0x181   : > { %1436 = vmatpush1.bf16.msra.mxu0 %v2912_v31  ;;  %1479 = vmatpush1.bf16.msra.mxu1 %v2915_v32 }
 0x182   : > { %1437 = vmatprep.subr.bf16.mxu0 %v2920_v33  ;;  %1480 = vmatprep.subr.bf16.mxu1 %v2924_v34 }
 0x185   : > { %1438 = vmatpush1.bf16.msra.mxu0 %v2927_v36  ;;  %1481 = vmatpush1.bf16.msra.mxu1 %v2930_v37 }
 0x186   : > { %1439 = vmatprep.subr.bf16.mxu0 %v2932_v38  ;;  %1482 = vmatprep.subr.bf16.mxu1 %v2934_v39 }
 0x189   : > { %1440 = vmatpush1.bf16.msra.mxu0 %v2939_v40  ;;  %1483 = vmatpush1.bf16.msra.mxu1 %v2943_v43 }
 0x23f   : > { %v1094_v7 = vpop.f32.mrb[4].mxu0  ;;  %v1137_v9 = vpop.f32.mrb[4].mxu1 }
 0x240   : > { %v2271_v11 = vadd.f32 %v1094_v7, %v2992_v50  ;;  %v1096_v12 = vpop.f32.mrb[5].mxu0  ;;  %v1139_v13 = vpop.f32.mrb[5].mxu1  ;;  %v2287_v54 = vadd.f32 %v1137_v9, %v3002_v10 }
 0x241   : > { %v2272_v14 = vadd.f32 %v1096_v12, %v2994_v51  ;;  %v1098_v16 = vpop.f32.mrb[6].mxu0  ;;  %v1141_v17 = vpop.f32.mrb[6].mxu1  ;;  %v2288_v53 = vadd.f32 %v1139_v13, %v2999_v2 }
 0x242   : > { %v2136_v18 = vmul.f32 -1.442695, %v2271_v11  ;;  %v2273_v19 = vadd.f32 %v1098_v16, %v2992_v50  ;;  %v1100_v20 = vpop.f32.mrb[7].mxu0  ;;  %v1143_v21 = vpop.f32.mrb[7].mxu1  ;;  %v2289_v57 = vadd.f32 %v1141_v17, %v3002_v10 }
 0x243   : > { %v2138_v22 = vmul.f32 -1.442695, %v2272_v14  ;;  %v2274_v23 = vadd.f32 %v1100_v20, %v2994_v51  ;;  %v2140_v55 = vmul.f32 -1.442695, %v2288_v53  ;;  %v2290_v56 = vadd.f32 %v1143_v21, %v2999_v2  ;;  %v2450_v21 = vld [vmem:[#allocation5 + $0xc] ss:$16 sps:$4 sm:$0xff]  }
 0x244   : > { %2501 = vpow2.f32 %v2136_v18  ;;  %v2137_v48 = vmul.f32 -1.442695, %v2273_v19  ;;  %1833 = vmatprep.subr.bf16.mxu1 %v2450_v21  ;;  %v2451_v53 = vld [vmem:[#allocation5 + $0x20] ss:$16 sps:$4 sm:$0xff]  }
 0x245   : > { %2503 = vpow2.f32 %v2138_v22  ;;  %v2139_v52 = vmul.f32 -1.442695, %v2274_v23  ;;  %v2141_v61 = vmul.f32 -1.442695, %v2290_v56  ;;  %v2445_v22 = vld [vmem:[#allocation5] ss:$16 sps:$4 sm:$0xff]  }
 0x246   : > { %2505 = vpow2.f32 %v2137_v48  ;;  %v2448_v23 = vld [vmem:[#allocation5 + $0x8] ss:$16 sps:$4 sm:$0xff]   ;;  %v2453_v48 = vld [vmem:[#allocation5 + $0x24] ss:$16 sps:$4 sm:$0xff]   ;;  %v2462_v56 = vld [vmem:[#allocation5 + $0x4c] ss:$16 sps:$4 sm:$0xff]  }
 0x247   : > { %2507 = vpow2.f32 %v2139_v52  ;;  %v2456_v52 = vld [vmem:[#allocation5 + $0x2c] ss:$16 sps:$4 sm:$0xff]  }
 0x248   : > { %2509 = vtanh.f32 %v2287_v54  ;;  %v2454_v54 = vld [vmem:[#allocation5 + $0x28] ss:$16 sps:$4 sm:$0xff]  }
 0x249   : > { %2511 = vpow2.f32 %v2140_v55  ;;  %v2459_v55 = vld [vmem:[#allocation5 + $0x44] ss:$16 sps:$4 sm:$0xff]  }
 0x24a   : > { %2513 = vtanh.f32 %v2289_v57  ;;  %v2457_v57 = vld [vmem:[#allocation5 + $0x40] ss:$16 sps:$4 sm:$0xff]  }
 0x24e   : > { %v2502_v58 = vpop.eup %2501 }
 0x24f   : > { %v2504_v59 = vpop.eup %2503  ;;  %v1160_v60 = vadd.f32 1.0, %v2502_v58  ;;  %v2465_v58 = vld [vmem:[#allocation5 + $0x64] ss:$16 sps:$4 sm:$0xff]  }
 0x250   : > { %v1172_v62 = vadd.f32 1.0, %v2504_v59  ;;  %v2506_v63 = vpop.eup %2505  ;;  %v2468_v59 = vld [vmem:[#allocation5 + $0x6c] ss:$16 sps:$4 sm:$0xff]  }
 0x251   : > { %2515 = vrcp.f32 %v1160_v60  ;;  %v1161_v0 = vadd.f32 1.0, %v2506_v63  ;;  %v2508_v1 = vpop.eup %2507  ;;  %v2463_v60 = vld [vmem:[#allocation5 + $0x60] ss:$16 sps:$4 sm:$0xff]  }
 0x252   : > { %2517 = vrcp.f32 %v1172_v62  ;;  %v1173_v4 = vadd.f32 1.0, %v2508_v1  ;;  %v2510_v6 = vpop.eup %2509 }
 0x253   : > { %2519 = vpow2.f32 %v2141_v61  ;;  %v2512_v8 = vpop.eup %2511  ;;  %v2466_v61 = vld [vmem:[#allocation5 + $0x68] ss:$16 sps:$4 sm:$0xff]  }
 0x254   : > { %2521 = vrcp.f32 %v1161_v0  ;;  %v2514_v15 = vpop.eup %2513  ;;  %v1186_v47 = vadd.f32 1.0, %v2512_v8 }
 0x255   : > { %2523 = vrcp.f32 %v1173_v4 }
 0x256   : > { %2525 = vrcp.f32 %v1186_v47 }
 0x25b   : > { %v2516_v26 = vpop.eup %2515 }
 0x25c   : > { %v2518_v41 = vpop.eup %2517  ;;  %v1194_v42 = vmul.f32 %v2516_v26, %v2510_v6 }
 0x25d   : > { %v2520_v44 = vpop.eup %2519  ;;  %v1192_v45 = vmul.f32 %v2518_v41, %v3008_v5 }
 0x25e   : > { %v2522_v46 = vpop.eup %2521  ;;  %v1187_v11 = vadd.f32 1.0, %v2520_v44 }
 0x25f   : > { %v3056_v49 = vadd.f32 %v1194_v42, %v1192_v45  ;;  %v1195_v7 = vmul.f32 %v2522_v46, %v2514_v15  ;;  %v2524_v9 = vpop.eup %2523 }
 0x260   : > { %v1193_v12 = vmul.f32 %v2524_v9, %v3011_v35  ;;  %v2526_v14 = vpop.eup %2525  ;;  %v2447_v35 = vld [vmem:[#allocation5 + $0x4] ss:$16 sps:$4 sm:$0xff]  }
 0x261   : > { %2527 = vtanh.f32 %v3056_v49  ;;  %1790 = vmatprep.subr.bf16.mxu0 %v2447_v35 }
 0x262   : > { %v3060_v13 = vadd.f32 %v1195_v7, %v1193_v12  ;;  %2529 = vrcp.f32 %v1187_v11 }
 0x264   : > { %2531 = vtanh.f32 %v3060_v13 }
 0x26b   : > { %v2528_v5 = vpop.eup %2527 }
 0x26c   : > { %v2530_v16 = vpop.eup %2529  ;;  %v1200_v18 = vmul.f32 %v2528_v5, %v2526_v14 }
 0x26e   : > { %v2532_v17 = vpop.eup %2531 }
 0x26f   : > { %v1201_v19 = vmul.f32 %v2532_v17, %v2530_v16 }
 0x271   : > { %v2252_v20 = vpack.c.bf16 %v1201_v19, %v1200_v18 }
 0x273   : > { %2264 = vst [vmem:[%s2819_s7 + $0x8] sm:$0xff] %v2252_v20   ;;  %1458 = vmatmul.mubr.bf16.vlgmr.msra.gmra.mrb[8].mxu0 %v2252_v20  ;;  %1501 = vmatmul.mubr.bf16.vlgmr.msra.gmra.mrb[8].mxu1 %v2252_v20 }
 0x274   : > { %1822 = vmatprep.mubr.bf16.mxu0 %v2697_v3  ;;  %1865 = vmatprep.mubr.bf16.mxu1 %v2697_v3  ;;  %v2460_v3 = vld [vmem:[#allocation5 + $0x48] ss:$16 sps:$4 sm:$0xff]  }
 0x275   : > { %1791 = vmatpush1.bf16.msra.mxu0 %v2445_v22  ;;  %1834 = vmatpush1.bf16.msra.mxu1 %v2448_v23 }
 0x276   : > { %1792 = vmatprep.subr.bf16.mxu0 %v2453_v48  ;;  %1835 = vmatprep.subr.bf16.mxu1 %v2456_v52 }
 0x279   : > { %1793 = vmatpush1.bf16.msra.mxu0 %v2451_v53  ;;  %1836 = vmatpush1.bf16.msra.mxu1 %v2454_v54 }
 0x27a   : > { %1794 = vmatprep.subr.bf16.mxu0 %v2459_v55  ;;  %1837 = vmatprep.subr.bf16.mxu1 %v2462_v56 }
 0x27d   : > { %1795 = vmatpush1.bf16.msra.mxu0 %v2457_v57  ;;  %1838 = vmatpush1.bf16.msra.mxu1 %v2460_v3 }
 0x27e   : > { %1796 = vmatprep.subr.bf16.mxu0 %v2465_v58  ;;  %1839 = vmatprep.subr.bf16.mxu1 %v2468_v59 }
 0x281   : > { %1797 = vmatpush1.bf16.msra.mxu0 %v2463_v60  ;;  %1840 = vmatpush1.bf16.msra.mxu1 %v2466_v61 }
 0x282   : > { %1798 = vmatprep.subr.bf16.mxu0 %v2891_v24  ;;  %1841 = vmatprep.subr.bf16.mxu1 %v2895_v25 }
 0x285   : > { %1799 = vmatpush1.bf16.msra.mxu0 %v2899_v27  ;;  %1842 = vmatpush1.bf16.msra.mxu1 %v2903_v28 }
 0x286   : > { %1800 = vmatprep.subr.bf16.mxu0 %v2905_v29  ;;  %1843 = vmatprep.subr.bf16.mxu1 %v2908_v30 }
 0x289   : > { %1801 = vmatpush1.bf16.msra.mxu0 %v2912_v31  ;;  %1844 = vmatpush1.bf16.msra.mxu1 %v2915_v32 }
 0x28a   : > { %1802 = vmatprep.subr.bf16.mxu0 %v2920_v33  ;;  %1845 = vmatprep.subr.bf16.mxu1 %v2924_v34 }
 0x28d   : > { %1803 = vmatpush1.bf16.msra.mxu0 %v2927_v36  ;;  %1846 = vmatpush1.bf16.msra.mxu1 %v2930_v37 }
 0x28e   : > { %1804 = vmatprep.subr.bf16.mxu0 %v2932_v38  ;;  %1847 = vmatprep.subr.bf16.mxu1 %v2934_v39 }
 0x291   : > { %1805 = vmatpush1.bf16.msra.mxu0 %v2939_v40  ;;  %1848 = vmatpush1.bf16.msra.mxu1 %v2943_v43 }
 0x346   : > { %v1459_v24 = vpop.f32.mrb[8].mxu0  ;;  %v1502_v25 = vpop.f32.mrb[8].mxu1 }
 0x347   : > { %v2275_v27 = vadd.f32 %v1459_v24, %v2992_v50  ;;  %v1461_v28 = vpop.f32.mrb[9].mxu0  ;;  %v1504_v29 = vpop.f32.mrb[9].mxu1  ;;  %v2291_v63 = vadd.f32 %v1502_v25, %v3002_v10 }
 0x348   : > { %v2276_v30 = vadd.f32 %v1461_v28, %v2994_v51  ;;  %v1463_v31 = vpop.f32.mrb[10].mxu0  ;;  %v1506_v32 = vpop.f32.mrb[10].mxu1  ;;  %v2292_v62 = vadd.f32 %v1504_v29, %v2999_v2 }
 0x349   : > { %v2178_v33 = vmul.f32 -1.442695, %v2275_v27  ;;  %v2277_v34 = vadd.f32 %v1463_v31, %v2992_v50  ;;  %v1465_v36 = vpop.f32.mrb[11].mxu0  ;;  %v1508_v37 = vpop.f32.mrb[11].mxu1  ;;  %v2293_v4 = vadd.f32 %v1506_v32, %v3002_v10 }
 0x34a   : > { %v2180_v38 = vmul.f32 -1.442695, %v2276_v30  ;;  %v2278_v39 = vadd.f32 %v1465_v36, %v2994_v51  ;;  %v2182_v0 = vmul.f32 -1.442695, %v2292_v62  ;;  %v2294_v1 = vadd.f32 %v1508_v37, %v2999_v2 }
 0x34b   : > { %2533 = vpow2.f32 %v2178_v33  ;;  %v2179_v40 = vmul.f32 -1.442695, %v2277_v34 }
 0x34c   : > { %2535 = vpow2.f32 %v2180_v38  ;;  %v2181_v43 = vmul.f32 -1.442695, %v2278_v39  ;;  %v2183_v26 = vmul.f32 -1.442695, %v2294_v1 }
 0x34d   : > { %2537 = vpow2.f32 %v2179_v40 }
 0x34e   : > { %2539 = vpow2.f32 %v2181_v43 }
 0x34f   : > { %2541 = vtanh.f32 %v2291_v63 }
 0x350   : > { %2543 = vpow2.f32 %v2182_v0 }
 0x351   : > { %2545 = vtanh.f32 %v2293_v4 }
 0x355   : > { %v2534_v6 = vpop.eup %2533 }
 0x356   : > { %v2536_v8 = vpop.eup %2535  ;;  %v1525_v15 = vadd.f32 1.0, %v2534_v6 }
 0x357   : > { %v1537_v41 = vadd.f32 1.0, %v2536_v8  ;;  %v2538_v42 = vpop.eup %2537 }
 0x358   : > { %2547 = vrcp.f32 %v1525_v15  ;;  %v1526_v44 = vadd.f32 1.0, %v2538_v42  ;;  %v2540_v45 = vpop.eup %2539 }
 0x359   : > { %2549 = vrcp.f32 %v1537_v41  ;;  %v1538_v46 = vadd.f32 1.0, %v2540_v45  ;;  %v2542_v47 = vpop.eup %2541 }
 0x35a   : > { %2551 = vpow2.f32 %v2183_v26  ;;  %v2544_v7 = vpop.eup %2543 }
 0x35b   : > { %2553 = vrcp.f32 %v1526_v44  ;;  %v2546_v9 = vpop.eup %2545  ;;  %v1551_v18 = vadd.f32 1.0, %v2544_v7 }
 0x35c   : > { %2555 = vrcp.f32 %v1538_v46 }
 0x35d   : > { %2557 = vrcp.f32 %v1551_v18 }
 0x362   : > { %v2548_v11 = vpop.eup %2547 }
 0x363   : > { %v2550_v12 = vpop.eup %2549  ;;  %v1559_v14 = vmul.f32 %v2548_v11, %v2542_v47 }
 0x364   : > { %v2552_v5 = vpop.eup %2551  ;;  %v1557_v16 = vmul.f32 %v2550_v12, %v3056_v49 }
 0x365   : > { %v2554_v17 = vpop.eup %2553  ;;  %v1552_v21 = vadd.f32 1.0, %v2552_v5 }
 0x366   : > { %v3091_v19 = vadd.f32 %v1559_v14, %v1557_v16  ;;  %v1560_v20 = vmul.f32 %v2554_v17, %v2546_v9  ;;  %v2556_v35 = vpop.eup %2555 }
 0x367   : > { %v1558_v22 = vmul.f32 %v2556_v35, %v3060_v13  ;;  %v2558_v48 = vpop.eup %2557 }
 0x368   : > { %2559 = vtanh.f32 %v3091_v19 }
 0x369   : > { %v3095_v23 = vadd.f32 %v1560_v20, %v1558_v22  ;;  %2561 = vrcp.f32 %v1552_v21 }
 0x36b   : > { %2563 = vtanh.f32 %v3095_v23 }
 0x372   : > { %v2560_v49 = vpop.eup %2559 }
 0x373   : > { %v2562_v52 = vpop.eup %2561  ;;  %v1565_v54 = vmul.f32 %v2560_v49, %v2558_v48 }
 0x375   : > { %v2564_v53 = vpop.eup %2563 }
 0x376   : > { %v1566_v55 = vmul.f32 %v2564_v53, %v2562_v52 }
 0x378   : > { %v2257_v56 = vpack.c.bf16 %v1566_v55, %v1565_v54 }
 0x37a   : > { %2265 = vst [vmem:[%s2819_s7 + $0x10] sm:$0xff] %v2257_v56   ;;  %1823 = vmatmul.mubr.bf16.vlgmr.msra.gmra.mrb[12].mxu0 %v2257_v56  ;;  %1866 = vmatmul.mubr.bf16.vlgmr.msra.gmra.mrb[12].mxu1 %v2257_v56 }
 0x44d   : > { %v1824_v57 = vpop.f32.mrb[12].mxu0  ;;  %v1867_v13 = vpop.f32.mrb[12].mxu1 }
 0x44e   : > { %v2279_v3 = vadd.f32 %v1824_v57, %v2992_v50  ;;  %v1826_v58 = vpop.f32.mrb[13].mxu0  ;;  %v1869_v59 = vpop.f32.mrb[13].mxu1  ;;  %v2295_v36 = vadd.f32 %v1867_v13, %v3002_v10 }
 0x44f   : > { %v2280_v60 = vadd.f32 %v1826_v58, %v2994_v51  ;;  %v1828_v61 = vpop.f32.mrb[14].mxu0  ;;  %v1871_v24 = vpop.f32.mrb[14].mxu1  ;;  %v2296_v34 = vadd.f32 %v1869_v59, %v2999_v2 }
 0x450   : > { %v2220_v25 = vmul.f32 -1.442695, %v2279_v3  ;;  %v2281_v27 = vadd.f32 %v1828_v61, %v2992_v50  ;;  %v1830_v28 = vpop.f32.mrb[15].mxu0  ;;  %v1873_v29 = vpop.f32.mrb[15].mxu1  ;;  %v2297_v50 = vadd.f32 %v1871_v24, %v3002_v10 }
 0x451   : > { %v2222_v30 = vmul.f32 -1.442695, %v2280_v60  ;;  %v2282_v31 = vadd.f32 %v1830_v28, %v2994_v51  ;;  %v2224_v37 = vmul.f32 -1.442695, %v2296_v34  ;;  %v2298_v38 = vadd.f32 %v1873_v29, %v2999_v2 }
 0x452   : > { %2565 = vpow2.f32 %v2220_v25  ;;  %v2221_v32 = vmul.f32 -1.442695, %v2281_v27 }
 0x453   : > { %2567 = vpow2.f32 %v2222_v30  ;;  %v2223_v33 = vmul.f32 -1.442695, %v2282_v31  ;;  %v2225_v51 = vmul.f32 -1.442695, %v2298_v38 }
 0x454   : > { %2569 = vpow2.f32 %v2221_v32 }
 0x455   : > { %2571 = vpow2.f32 %v2223_v33 }
 0x456   : > { %2573 = vtanh.f32 %v2295_v36 }
 0x457   : > { %2575 = vpow2.f32 %v2224_v37 }
 0x458   : > { %2577 = vtanh.f32 %v2297_v50 }
 0x45c   : > { %v2566_v39 = vpop.eup %2565 }
 0x45d   : > { %v2568_v40 = vpop.eup %2567  ;;  %v1890_v43 = vadd.f32 1.0, %v2566_v39 }
 0x45e   : > { %v1902_v62 = vadd.f32 1.0, %v2568_v40  ;;  %v2570_v63 = vpop.eup %2569 }
 0x45f   : > { %2579 = vrcp.f32 %v1890_v43  ;;  %v1891_v0 = vadd.f32 1.0, %v2570_v63  ;;  %v2572_v1 = vpop.eup %2571 }
 0x460   : > { %2581 = vrcp.f32 %v1902_v62  ;;  %v1903_v4 = vadd.f32 1.0, %v2572_v1  ;;  %v2574_v2 = vpop.eup %2573 }
 0x461   : > { %2583 = vpow2.f32 %v2225_v51  ;;  %v2576_v6 = vpop.eup %2575 }
 0x462   : > { %2585 = vrcp.f32 %v1891_v0  ;;  %v2578_v10 = vpop.eup %2577  ;;  %v1916_v41 = vadd.f32 1.0, %v2576_v6 }
 0x463   : > { %2587 = vrcp.f32 %v1903_v4 }
 0x464   : > { %2589 = vrcp.f32 %v1916_v41 }
 0x469   : > { %v2580_v8 = vpop.eup %2579 }
 0x46a   : > { %v2582_v15 = vpop.eup %2581  ;;  %v1924_v26 = vmul.f32 %v2580_v8, %v2574_v2 }
 0x46b   : > { %v2584_v42 = vpop.eup %2583  ;;  %v1922_v44 = vmul.f32 %v2582_v15, %v3091_v19 }
 0x46c   : > { %v2586_v45 = vpop.eup %2585  ;;  %v1917_v9 = vadd.f32 1.0, %v2584_v42 }
 0x46d   : > { %v1926_v46 = vadd.f32 %v1924_v26, %v1922_v44  ;;  %v1925_v47 = vmul.f32 %v2586_v45, %v2578_v10  ;;  %v2588_v7 = vpop.eup %2587 }
 0x46e   : > { %v1923_v11 = vmul.f32 %v2588_v7, %v3095_v23  ;;  %v2590_v14 = vpop.eup %2589 }
 0x46f   : > { %2591 = vtanh.f32 %v1926_v46  ;;  %1932 = vst [vmem:[#allocation4] sm:$0xff] %v1926_v46 }
 0x470   : > { %v1927_v12 = vadd.f32 %v1925_v47, %v1923_v11  ;;  %2593 = vrcp.f32 %v1917_v9 }
 0x472   : > { %2595 = vtanh.f32 %v1927_v12  ;;  %1933 = vst [vmem:[#allocation4 + $0x8] sm:$0xff] %v1927_v12 }
 0x479   : > { %v2592_v5 = vpop.eup %2591 }
 0x47a   : > { %v1930_v16 = vmul.f32 %v2592_v5, %v2590_v14  ;;  %v2594_v17 = vpop.eup %2593 }
 0x47c   : > { %1934 = vst [vmem:[#allocation3] sm:$0xff] %v1930_v16  ;;  %v2596_v18 = vpop.eup %2595 }
 0x47d   : > { %v1931_v19 = vmul.f32 %v2596_v18, %v2594_v17 }
 0x47f   : > { %1935 = vst [vmem:[#allocation3 + $0x8] sm:$0xff] %v1931_v19  ;;  %v2262_v20 = vpack.c.bf16 %v1931_v19, %v1930_v16 }
 0x481   : > { %2266 = vst [vmem:[%s2819_s7 + $0x18] sm:$0xff] %v2262_v20  }
 0x482   : > { %2638 = shalt.err (!%p2635_p8)
}
 0x483   : > { %s2639_s23 = scalar_lea.hbm %s3114_s27, 512  ;;  %s2643_s13 = scalar_lea.hbm %s3166_s4, 1024 }
 0x484   : > { %p2640_p12 = scmp.ne.s32.totalorder %s3114_s27, %s2639_s23  ;;  %p2644_p1 = scmp.lt.u32.totalorder %s3114_s27, %s3166_s4 }
 0x485   : > { %p2645_p5 = scmp.lt.u32.totalorder %s2643_s13, %s2639_s23  ;;  %p2647_p9 = scmp.lt.u32.totalorder %s2639_s23, %s3114_s27 }
 0x486   : > { %p2641_p0 = pnand %p2640_p12, %p3178_p10 }
 0x487   : > { %p2646_p6 = por %p2645_p5, %p2644_p1 }
 0x488   : > { %p2642_p2 = pneg %p2641_p0 }
 0x489   : > { %p2648_p11 = por %p2647_p9, %p2646_p6 }
 0x48b   : > { %p2649_p13 = pnand %p2648_p11, %p2642_p2 }
 0x48d   : > { %2652 = shalt.err (!%p2649_p13)
}
 0x48e   : > { %s2699_s22 = smov 64   ;;  %s2700_s28 = smov 4  }
 0x48f   : > { %2335 = dma.vmem_to_hbm [thread:$0]  (%p3178_p10), %s3116_s5, 512, %s3114_s27, %s3121_s8, %s2699_s22, %s2699_s22, %s2700_s28  }
 0x490 PF: > { %p2347_p3 = scmp.ge.s32.totalorder %s2691_s18, 2  ;;  %s1976_s30 = sand.u32 1, %s2679_s15  }
 0x491   : > { %p3179_p4 = scmp.ne.s32.totalorder %s3171_s26, 0  ;;  %s1977_s29 = scalar_lea.sflag [#allocation7], %s1976_s30 }
 0x493   : > { %p2342_p7 = pnand %p2347_p3, %p3179_p4 }
 0x495   : > { %2674 = dma.done.wait (!%p2342_p7), %s1977_s29, 512  }
 0x496   : > { %2676 = vsyncadd (!%p2342_p7), %s1977_s29, 4294966784  ;;  %p15_p8 = scmp.ge.s32.totalorder %s2751_s21, 4   ;;  %s3180_s15 = smov %s2683_s16 }
 0x497   : > { %s3181_s16 = smov %s2687_s17  ;;  %s3182_s17 = smov %s2762_s24 }
 0x498   : > { %s3183_s18 = smov %s2751_s21  ;;  %17 = sbr.rel (!%p15_p8) target bundleno = 4 (0x4), region = 87 }
 0x49f   :  { %1982 = vsyncpa [#allocation6], 1 }
 0x4a0   :  { %1984 = vsyncpa [#allocation6 + $0x1], 1 }
 0x4a1   :  { %1985 = vsyncpa [#allocation7], 1 }
 0x4a2   :  { %1987 = vsyncpa [#allocation7 + $0x1], 1 }

</bundles_post_ra>
